<compile_context>
chip_gen: v5e
topology: v5e:2x2
jax: 0.10.0
libtpu: 0.0.40
codegen_flags: <defaults>
</compile_context>

<pallas_src>
import functools

import jax
import jax.numpy as jnp
from jax import lax
from jax.experimental import pallas as pl
from jax.experimental.pallas import tpu as pltpu


def _round_up(x, m):
    return ((x + m - 1) // m) * m


def _bn_relu_conv3x3_kernel(xf_ref, gamma_ref, beta_ref, w_ref, o_ref,
                            y_ref, im_ref, *, H, W, Wp, MROWS, eps):
    # xf_ref:    [PR, CIN]        zero-padded, row-flattened input (f32)
    # gamma_ref: [1, CIN]         BN scale
    # beta_ref:  [1, CIN]         BN shift
    # w_ref:     [9*CIN, COUT]    conv taps flattened (kh,kw,cin major), bf16
    # o_ref:     [MROWS, COUT]    flat output slab (f32)
    # y_ref:     [PR, CIN]        bf16 scratch for normalized/ReLU'd activations
    # im_ref:    [MROWS, 9*CIN]   bf16 im2col slab
    PR, CIN = xf_ref.shape
    inv_n = 1.0 / float(H * W)

    xf = xf_ref[...]                                       # [PR, CIN] f32

    # Interior mask generated in-kernel (no mask input / DMA).  Flat row
    # i = r*Wp + c is an interior pixel iff 1<=r<=H and 1<=c<=W, i.e. i lies
    # in one of H static intervals [r*Wp+1, r*Wp+W].  Pure compares/ors on a
    # single iota column -- trivially cheap and guaranteed to lower.
    idx = lax.broadcasted_iota(jnp.int32, (PR, 1), 0)
    interior = None
    for row in range(1, H + 1):
        band = (idx >= row * Wp + 1) & (idx <= row * Wp + W)
        interior = band if interior is None else (interior | band)
    mask = jnp.where(interior, jnp.float32(1.0), jnp.float32(0.0))  # [PR,1]

    # --- BatchNorm (training mode: biased batch stats), two-pass variance.
    # Halo/pad rows are exactly zero so they do not perturb the mean; the
    # centered values are re-masked so they do not perturb the variance.
    mean = jnp.sum(xf, axis=0, keepdims=True) * inv_n      # [1, CIN]
    d = (xf - mean) * mask                                 # centered, halo = 0
    var = jnp.sum(d * d, axis=0, keepdims=True) * inv_n    # biased variance
    scale = gamma_ref[...] * lax.rsqrt(var + eps)

    # --- BN + ReLU + halo re-zero, all in f32; ONE cast to bf16 on the store.
    y = jnp.maximum(d * scale + beta_ref[...], 0.0) * mask
    y_ref[...] = y.astype(jnp.bfloat16)

    # --- im2col: 9 shifted copies into lane-aligned 128-wide column blocks.
    # Flattened-row trick: output flat index i = oh*Wp + ow; tap (kh, kw)
    # reads rows i + kh*Wp + kw.  (Rows with ow >= W are garbage and are
    # discarded by the wrapper.)
    for t in range(9):
        off = (t // 3) * Wp + (t % 3)
        im_ref[:, pl.ds(t * CIN, CIN)] = y_ref[pl.ds(off, MROWS), :]

    # --- One long-K MXU matmul: [MROWS, 9*CIN] x [9*CIN, COUT], f32 accum.
    o_ref[...] = jnp.dot(im_ref[...], w_ref[...],
                         preferred_element_type=jnp.float32)


def prepare_params(gamma, beta, w_oihw):
    """One-time (init) preprocessing of the constant parameters."""
    COUT, CIN, KH, KW = w_oihw.shape
    # OIHW -> [(kh*KW+kw)*CIN + cin, cout], matching the im2col column order.
    w_flat = (jnp.transpose(w_oihw, (2, 3, 1, 0))
              .reshape(KH * KW * CIN, COUT).astype(jnp.bfloat16))
    gamma2 = gamma.reshape(1, CIN).astype(jnp.float32)
    beta2 = beta.reshape(1, CIN).astype(jnp.float32)
    return w_flat, gamma2, beta2


def bn_relu_conv2d(x_nchw, w_flat, gamma2, beta2, eps=1e-5):
    """NCHW in / NCHW out wrapper around the fused Pallas kernel (N must be 1)."""
    N, CIN, H, W = x_nchw.shape
    assert N == 1, "kernel implements the module's N=1 forward"
    K2CIN, COUT = w_flat.shape
    assert K2CIN == 9 * CIN

    Wp = W + 2
    MROWS = _round_up(H * Wp, 8)                   # flat output rows (7*9=63 -> 64)
    rows_needed = -(-(2 * Wp + 2 + MROWS) // Wp)   # padded image rows the taps read
    bottom = max(1, rows_needed - (H + 1))
    PR = (H + 1 + bottom) * Wp                     # flat padded-input rows (90)

    # Channels-last + single zero-pad (halo + tail rows), flatten rows.
    xf = jnp.transpose(x_nchw[0], (1, 2, 0)).astype(jnp.float32)      # [H,W,CIN]
    xf = jnp.pad(xf, ((1, bottom), (1, 1), (0, 0))).reshape(PR, CIN)  # [PR,CIN]

    kernel = functools.partial(_bn_relu_conv3x3_kernel, H=H, W=W, Wp=Wp,
                               MROWS=MROWS, eps=eps)

    out_flat = pl.pallas_call(
        kernel,
        out_shape=jax.ShapeDtypeStruct((MROWS, COUT), jnp.float32),
        in_specs=[pl.BlockSpec(memory_space=pltpu.MemorySpace.VMEM)] * 4,
        out_specs=pl.BlockSpec(memory_space=pltpu.MemorySpace.VMEM),
        scratch_shapes=[pltpu.VMEM((PR, CIN), jnp.bfloat16),       # y (BN+ReLU)
                        pltpu.VMEM((MROWS, K2CIN), jnp.bfloat16)],  # im2col slab
        cost_estimate=pl.CostEstimate(
            flops=2 * MROWS * K2CIN * COUT,
            transcendentals=CIN,
            bytes_accessed=(PR * CIN * 4 + K2CIN * COUT * 2
                            + MROWS * COUT * 4)),
    )(xf, gamma2, beta2, w_flat)

    # Drop garbage columns (ow >= W) and return to NCHW.
    out = out_flat[: H * Wp].reshape(H, Wp, COUT)[:, :W, :]
    return jnp.transpose(out, (2, 0, 1))[None].astype(x_nchw.dtype)


if __name__ == "__main__":
    key = jax.random.PRNGKey(0)
    k1, k2, k3, k4 = jax.random.split(key, 4)

    # Shapes implied by the module: x [1, 128, 7, 7], conv weight [32, 128, 3, 3]
    x = jax.random.normal(k1, (1, 128, 7, 7), jnp.float32)
    gamma = 1.0 + 0.1 * jax.random.normal(k2, (128,), jnp.float32)
    beta = 0.1 * jax.random.normal(k3, (128,), jnp.float32)
    w = 0.05 * jax.random.normal(k4, (32, 128, 3, 3), jnp.float32)

    # Constant preprocessing hoisted out of the per-call path (done once).
    w_flat, gamma2, beta2 = prepare_params(gamma, beta, w)

    fused = jax.jit(bn_relu_conv2d)
    out = jax.block_until_ready(fused(x, w_flat, gamma2, beta2))

    # Pure-JAX reference (same semantics as the PyTorch forward in training
    # mode: batch stats with biased variance).
    mean = jnp.mean(x, axis=(0, 2, 3), keepdims=True)
    var = jnp.mean((x - mean) ** 2, axis=(0, 2, 3), keepdims=True)
    y = (x - mean) * lax.rsqrt(var + 1e-5) * gamma.reshape(1, -1, 1, 1) \
        + beta.reshape(1, -1, 1, 1)
    y = jnp.maximum(y, 0.0)
    ref = lax.conv_general_dilated(
        y, w, window_strides=(1, 1), padding=((1, 1), (1, 1)),
        dimension_numbers=("NCHW", "OIHW", "NCHW"))

    assert out.shape == (1, 32, 7, 7), out.shape
    # bf16 matmul operands (f32 accumulation) => slightly loose check.
    assert jnp.allclose(out, ref, atol=2e-2, rtol=2e-2), \
        float(jnp.max(jnp.abs(out - ref)))
    print("KERNEL_OK")
</pallas_src>

<mosaic_0001>
module attributes {stable_mosaic.version = 11 : i64} {
  func.func @_bn_relu_conv3x3_kernel(%arg0: memref<90x128xf32, #tpu.memory_space<vmem>>, %arg1: memref<1x128xf32, #tpu.memory_space<vmem>>, %arg2: memref<1x128xf32, #tpu.memory_space<vmem>>, %arg3: memref<1152x32xbf16, #tpu.memory_space<vmem>>, %arg4: memref<64x32xf32, #tpu.memory_space<vmem>>, %arg5: memref<90x128xbf16, #tpu.memory_space<vmem>>, %arg6: memref<64x1152xbf16, #tpu.memory_space<vmem>>) attributes {dimension_semantics = [], scalar_prefetch = 0 : i64, scratch_operands = 2 : i64, tpu.core_type = #tpu.core_type<tc>} {
    %c0 = arith.constant 0 : index
    %c0_0 = arith.constant 0 : index
    %0 = vector.load %arg0[%c0, %c0_0] : memref<90x128xf32, #tpu.memory_space<vmem>>, vector<90x128xf32>
    %1 = tpu.iota {dimensions = array<i32: 0>} : vector<90x1xi32>
    %c10_i32 = arith.constant 10 : i32
    %2 = vector.broadcast %c10_i32 : i32 to vector<90x1xi32>
    %3 = arith.cmpi sge, %1, %2 : vector<90x1xi32>
    %c16_i32 = arith.constant 16 : i32
    %4 = vector.broadcast %c16_i32 : i32 to vector<90x1xi32>
    %5 = arith.cmpi sle, %1, %4 : vector<90x1xi32>
    %6 = arith.andi %3, %5 : vector<90x1xi1>
    %c19_i32 = arith.constant 19 : i32
    %7 = vector.broadcast %c19_i32 : i32 to vector<90x1xi32>
    %8 = arith.cmpi sge, %1, %7 : vector<90x1xi32>
    %c25_i32 = arith.constant 25 : i32
    %9 = vector.broadcast %c25_i32 : i32 to vector<90x1xi32>
    %10 = arith.cmpi sle, %1, %9 : vector<90x1xi32>
    %11 = arith.andi %8, %10 : vector<90x1xi1>
    %12 = arith.ori %6, %11 : vector<90x1xi1>
    %c28_i32 = arith.constant 28 : i32
    %13 = vector.broadcast %c28_i32 : i32 to vector<90x1xi32>
    %14 = arith.cmpi sge, %1, %13 : vector<90x1xi32>
    %c34_i32 = arith.constant 34 : i32
    %15 = vector.broadcast %c34_i32 : i32 to vector<90x1xi32>
    %16 = arith.cmpi sle, %1, %15 : vector<90x1xi32>
    %17 = arith.andi %14, %16 : vector<90x1xi1>
    %18 = arith.ori %12, %17 : vector<90x1xi1>
    %c37_i32 = arith.constant 37 : i32
    %19 = vector.broadcast %c37_i32 : i32 to vector<90x1xi32>
    %20 = arith.cmpi sge, %1, %19 : vector<90x1xi32>
    %c43_i32 = arith.constant 43 : i32
    %21 = vector.broadcast %c43_i32 : i32 to vector<90x1xi32>
    %22 = arith.cmpi sle, %1, %21 : vector<90x1xi32>
    %23 = arith.andi %20, %22 : vector<90x1xi1>
    %24 = arith.ori %18, %23 : vector<90x1xi1>
    %c46_i32 = arith.constant 46 : i32
    %25 = vector.broadcast %c46_i32 : i32 to vector<90x1xi32>
    %26 = arith.cmpi sge, %1, %25 : vector<90x1xi32>
    %c52_i32 = arith.constant 52 : i32
    %27 = vector.broadcast %c52_i32 : i32 to vector<90x1xi32>
    %28 = arith.cmpi sle, %1, %27 : vector<90x1xi32>
    %29 = arith.andi %26, %28 : vector<90x1xi1>
    %30 = arith.ori %24, %29 : vector<90x1xi1>
    %c55_i32 = arith.constant 55 : i32
    %31 = vector.broadcast %c55_i32 : i32 to vector<90x1xi32>
    %32 = arith.cmpi sge, %1, %31 : vector<90x1xi32>
    %c61_i32 = arith.constant 61 : i32
    %33 = vector.broadcast %c61_i32 : i32 to vector<90x1xi32>
    %34 = arith.cmpi sle, %1, %33 : vector<90x1xi32>
    %35 = arith.andi %32, %34 : vector<90x1xi1>
    %36 = arith.ori %30, %35 : vector<90x1xi1>
    %c64_i32 = arith.constant 64 : i32
    %37 = vector.broadcast %c64_i32 : i32 to vector<90x1xi32>
    %38 = arith.cmpi sge, %1, %37 : vector<90x1xi32>
    %c70_i32 = arith.constant 70 : i32
    %39 = vector.broadcast %c70_i32 : i32 to vector<90x1xi32>
    %40 = arith.cmpi sle, %1, %39 : vector<90x1xi32>
    %41 = arith.andi %38, %40 : vector<90x1xi1>
    %42 = arith.ori %36, %41 : vector<90x1xi1>
    %cst = arith.constant 1.000000e+00 : f32
    %cst_1 = arith.constant 0.000000e+00 : f32
    %43 = vector.broadcast %cst : f32 to vector<90x1xf32>
    %44 = vector.broadcast %cst_1 : f32 to vector<90x1xf32>
    %45 = arith.select %42, %43, %44 : vector<90x1xi1>, vector<90x1xf32>
    %cst_2 = arith.constant dense<0.000000e+00> : vector<128xf32>
    %46 = vector.multi_reduction <add>, %0, %cst_2 [0] : vector<90x128xf32> to vector<128xf32>
    %47 = vector.shape_cast %46 : vector<128xf32> to vector<1x128xf32>
    %cst_3 = arith.constant 0.0204081628 : f32
    %48 = vector.broadcast %cst_3 : f32 to vector<1x128xf32>
    %49 = arith.mulf %47, %48 : vector<1x128xf32>
    %50 = vector.broadcast %49 : vector<1x128xf32> to vector<90x128xf32>
    %51 = arith.subf %0, %50 : vector<90x128xf32>
    %52 = vector.broadcast %45 : vector<90x1xf32> to vector<90x128xf32>
    %53 = arith.mulf %51, %52 : vector<90x128xf32>
    %54 = arith.mulf %53, %53 : vector<90x128xf32>
    %cst_4 = arith.constant dense<0.000000e+00> : vector<128xf32>
    %55 = vector.multi_reduction <add>, %54, %cst_4 [0] : vector<90x128xf32> to vector<128xf32>
    %56 = vector.shape_cast %55 : vector<128xf32> to vector<1x128xf32>
    %cst_5 = arith.constant 0.0204081628 : f32
    %57 = vector.broadcast %cst_5 : f32 to vector<1x128xf32>
    %58 = arith.mulf %56, %57 : vector<1x128xf32>
    %c0_6 = arith.constant 0 : index
    %c0_7 = arith.constant 0 : index
    %59 = vector.load %arg1[%c0_6, %c0_7] : memref<1x128xf32, #tpu.memory_space<vmem>>, vector<1x128xf32>
    %cst_8 = arith.constant 9.99999974E-6 : f32
    %60 = vector.broadcast %cst_8 : f32 to vector<1x128xf32>
    %61 = arith.addf %58, %60 : vector<1x128xf32>
    %62 = math.rsqrt %61 : vector<1x128xf32>
    %63 = arith.mulf %59, %62 : vector<1x128xf32>
    %64 = vector.broadcast %63 : vector<1x128xf32> to vector<90x128xf32>
    %65 = arith.mulf %53, %64 : vector<90x128xf32>
    %c0_9 = arith.constant 0 : index
    %c0_10 = arith.constant 0 : index
    %66 = vector.load %arg2[%c0_9, %c0_10] : memref<1x128xf32, #tpu.memory_space<vmem>>, vector<1x128xf32>
    %67 = vector.broadcast %66 : vector<1x128xf32> to vector<90x128xf32>
    %68 = arith.addf %65, %67 : vector<90x128xf32>
    %cst_11 = arith.constant 0.000000e+00 : f32
    %69 = vector.broadcast %cst_11 : f32 to vector<90x128xf32>
    %70 = arith.maximumf %68, %69 : vector<90x128xf32>
    %71 = vector.broadcast %45 : vector<90x1xf32> to vector<90x128xf32>
    %72 = arith.mulf %70, %71 : vector<90x128xf32>
    %73 = arith.truncf %72 : vector<90x128xf32> to vector<90x128xbf16>
    %c0_12 = arith.constant 0 : index
    %c0_13 = arith.constant 0 : index
    %74 = vector.load %arg5[%c0_12, %c0_13] : memref<90x128xbf16, #tpu.memory_space<vmem>>, vector<90x128xbf16>
    tpu.vector_store %arg5[%c0_12, %c0_13], %73 {strides = array<i32>} : memref<90x128xbf16, #tpu.memory_space<vmem>>, vector<90x128xbf16>,
    %c0_14 = arith.constant 0 : index
    %c0_15 = arith.constant 0 : index
    %75 = vector.load %arg5[%c0_14, %c0_15] : memref<90x128xbf16, #tpu.memory_space<vmem>>, vector<64x128xbf16>
    %c0_16 = arith.constant 0 : index
    %c0_17 = arith.constant 0 : index
    %76 = vector.load %arg6[%c0_16, %c0_17] : memref<64x1152xbf16, #tpu.memory_space<vmem>>, vector<64x128xbf16>
    tpu.vector_store %arg6[%c0_16, %c0_17], %75 {strides = array<i32>} : memref<64x1152xbf16, #tpu.memory_space<vmem>>, vector<64x128xbf16>,
    %c1 = arith.constant 1 : index
    %c0_18 = arith.constant 0 : index
    %77 = vector.load %arg5[%c1, %c0_18] : memref<90x128xbf16, #tpu.memory_space<vmem>>, vector<64x128xbf16>
    %c0_19 = arith.constant 0 : index
    %c128 = arith.constant 128 : index
    %78 = vector.load %arg6[%c0_19, %c128] : memref<64x1152xbf16, #tpu.memory_space<vmem>>, vector<64x128xbf16>
    tpu.vector_store %arg6[%c0_19, %c128], %77 {strides = array<i32>} : memref<64x1152xbf16, #tpu.memory_space<vmem>>, vector<64x128xbf16>,
    %c2 = arith.constant 2 : index
    %c0_20 = arith.constant 0 : index
    %79 = vector.load %arg5[%c2, %c0_20] : memref<90x128xbf16, #tpu.memory_space<vmem>>, vector<64x128xbf16>
    %c0_21 = arith.constant 0 : index
    %c256 = arith.constant 256 : index
    %80 = vector.load %arg6[%c0_21, %c256] : memref<64x1152xbf16, #tpu.memory_space<vmem>>, vector<64x128xbf16>
    tpu.vector_store %arg6[%c0_21, %c256], %79 {strides = array<i32>} : memref<64x1152xbf16, #tpu.memory_space<vmem>>, vector<64x128xbf16>,
    %c9 = arith.constant 9 : index
    %c0_22 = arith.constant 0 : index
    %81 = vector.load %arg5[%c9, %c0_22] : memref<90x128xbf16, #tpu.memory_space<vmem>>, vector<64x128xbf16>
    %c0_23 = arith.constant 0 : index
    %c384 = arith.constant 384 : index
    %82 = vector.load %arg6[%c0_23, %c384] : memref<64x1152xbf16, #tpu.memory_space<vmem>>, vector<64x128xbf16>
    tpu.vector_store %arg6[%c0_23, %c384], %81 {strides = array<i32>} : memref<64x1152xbf16, #tpu.memory_space<vmem>>, vector<64x128xbf16>,
    %c10 = arith.constant 10 : index
    %c0_24 = arith.constant 0 : index
    %83 = vector.load %arg5[%c10, %c0_24] : memref<90x128xbf16, #tpu.memory_space<vmem>>, vector<64x128xbf16>
    %c0_25 = arith.constant 0 : index
    %c512 = arith.constant 512 : index
    %84 = vector.load %arg6[%c0_25, %c512] : memref<64x1152xbf16, #tpu.memory_space<vmem>>, vector<64x128xbf16>
    tpu.vector_store %arg6[%c0_25, %c512], %83 {strides = array<i32>} : memref<64x1152xbf16, #tpu.memory_space<vmem>>, vector<64x128xbf16>,
    %c11 = arith.constant 11 : index
    %c0_26 = arith.constant 0 : index
    %85 = vector.load %arg5[%c11, %c0_26] : memref<90x128xbf16, #tpu.memory_space<vmem>>, vector<64x128xbf16>
    %c0_27 = arith.constant 0 : index
    %c640 = arith.constant 640 : index
    %86 = vector.load %arg6[%c0_27, %c640] : memref<64x1152xbf16, #tpu.memory_space<vmem>>, vector<64x128xbf16>
    tpu.vector_store %arg6[%c0_27, %c640], %85 {strides = array<i32>} : memref<64x1152xbf16, #tpu.memory_space<vmem>>, vector<64x128xbf16>,
    %c18 = arith.constant 18 : index
    %c0_28 = arith.constant 0 : index
    %87 = vector.load %arg5[%c18, %c0_28] : memref<90x128xbf16, #tpu.memory_space<vmem>>, vector<64x128xbf16>
    %c0_29 = arith.constant 0 : index
    %c768 = arith.constant 768 : index
    %88 = vector.load %arg6[%c0_29, %c768] : memref<64x1152xbf16, #tpu.memory_space<vmem>>, vector<64x128xbf16>
    tpu.vector_store %arg6[%c0_29, %c768], %87 {strides = array<i32>} : memref<64x1152xbf16, #tpu.memory_space<vmem>>, vector<64x128xbf16>,
    %c19 = arith.constant 19 : index
    %c0_30 = arith.constant 0 : index
    %89 = vector.load %arg5[%c19, %c0_30] : memref<90x128xbf16, #tpu.memory_space<vmem>>, vector<64x128xbf16>
    %c0_31 = arith.constant 0 : index
    %c896 = arith.constant 896 : index
    %90 = vector.load %arg6[%c0_31, %c896] : memref<64x1152xbf16, #tpu.memory_space<vmem>>, vector<64x128xbf16>
    tpu.vector_store %arg6[%c0_31, %c896], %89 {strides = array<i32>} : memref<64x1152xbf16, #tpu.memory_space<vmem>>, vector<64x128xbf16>,
    %c20 = arith.constant 20 : index
    %c0_32 = arith.constant 0 : index
    %91 = vector.load %arg5[%c20, %c0_32] : memref<90x128xbf16, #tpu.memory_space<vmem>>, vector<64x128xbf16>
    %c0_33 = arith.constant 0 : index
    %c1024 = arith.constant 1024 : index
    %92 = vector.load %arg6[%c0_33, %c1024] : memref<64x1152xbf16, #tpu.memory_space<vmem>>, vector<64x128xbf16>
    tpu.vector_store %arg6[%c0_33, %c1024], %91 {strides = array<i32>} : memref<64x1152xbf16, #tpu.memory_space<vmem>>, vector<64x128xbf16>,
    %c0_34 = arith.constant 0 : index
    %c0_35 = arith.constant 0 : index
    %93 = vector.load %arg6[%c0_34, %c0_35] : memref<64x1152xbf16, #tpu.memory_space<vmem>>, vector<64x1152xbf16>
    %c0_36 = arith.constant 0 : index
    %c0_37 = arith.constant 0 : index
    %94 = vector.load %arg3[%c0_36, %c0_37] : memref<1152x32xbf16, #tpu.memory_space<vmem>>, vector<1152x32xbf16>
    %cst_38 = arith.constant dense<0.000000e+00> : vector<64x32xf32>
    %95 = tpu.matmul %93, %94, %cst_38 {dimension_numbers = #tpu.dot_dimension_numbers<[1], [0], [0], [1], [0, 0, 1, 1], [], []>} : vector<64x1152xbf16>, vector<1152x32xbf16>, vector<64x32xf32> -> vector<64x32xf32>
    %c0_39 = arith.constant 0 : index
    %c0_40 = arith.constant 0 : index
    %96 = vector.load %arg4[%c0_39, %c0_40] : memref<64x32xf32, #tpu.memory_space<vmem>>, vector<64x32xf32>
    tpu.vector_store %arg4[%c0_39, %c0_40], %95 {strides = array<i32>} : memref<64x32xf32, #tpu.memory_space<vmem>>, vector<64x32xf32>,
    return
  }
}

</mosaic_0001>

<bundles_post_ra>
// kernel: bn_relu_conv2d.1
= control target key start
LH: loop header
LB: loop body
LE: loop exit
PB: predicated region body
PF: predicated region fallthrough
CT: control target
= control target key end

     0   :  { %vm388_vm0 = vcmask 1041408   ;;  %v29_v38 = vlaneseq  ;;  %v2921_v56 = vmov 0.0   ;;  %s3748_s3 = inlined_call_operand.vmem [shape: bf16[1152,32], index: 3, kind: input, shape index: {}]   ;;  %s3749_s0 = inlined_call_operand.vmem [shape: f32[90,128], index: 0, kind: input, shape index: {}]   ;;  %s3750_s2 = inlined_call_operand.vmem [shape: f32[1,128], index: 2, kind: input, shape index: {}]   ;;  %s3751_s1 = inlined_call_operand.vmem [shape: f32[1,128], index: 1, kind: input, shape index: {}]   ;;  %s3752_s4 = inlined_call_operand.vmem [shape: f32[64,32], index: 4, kind: output, shape index: {}]  }
   0x1   :  { %v2806_v0 = vld [vmem:[%s3748_s3 + $0x38] sm:$0xff]  ;;  %v2805_v2 = vld [vmem:[%s3748_s3 + $0x30] sm:$0xff]  ;;  %v2968_v6 = vld [vmem:[%s3749_s0] sm:$0xff] }
   0x2   :  { %v2822_v1 = vld [vmem:[%s3748_s3 + $0xb8] sm:$0xff]  ;;  %2900 = vmatpush.bf16.msra.mxu1 %v2806_v0  ;;  %2053 = vmatpush.bf16.msra.mxu0 %v2806_v0  ;;  %v2821_v3 = vld [vmem:[%s3748_s3 + $0xb0] sm:$0xff]  ;;  %v2804_v7 = vld [vmem:[%s3748_s3 + $0x28] sm:$0xff]  ;;  %v30_v42 = vshrl.u32 %v29_v38, 7 }
   0x3   :  { %2111 = vmatpush.bf16.msra.mxu2 %v2822_v1  ;;  %v2830_v4 = vld [vmem:[%s3748_s3 + $0xf8] sm:$0xff]  ;;  %v2829_v5 = vld [vmem:[%s3748_s3 + $0xf0] sm:$0xff]  ;;  %v2976_v8 = vld [vmem:[%s3749_s0 + $0x8] sm:$0xff] }
   0x4   :  { %2140 = vmatpush.bf16.msra.mxu3 %v2830_v4  ;;  %v2981_v9 = vld [vmem:[%s3749_s0 + $0x10] sm:$0xff]  ;;  %v2820_v10 = vld [vmem:[%s3748_s3 + $0xa8] sm:$0xff]  ;;  %v378_v11 = vadd.f32 %v2976_v8, %v2968_v6  ;;  %v2991_v12 = vld [vmem:[%s3749_s0 + $0x18] sm:$0xff]  ;;  %v32_v45 = vadd.s32 16, %v30_v42  ;;  %v31_v47 = vadd.s32 8, %v30_v42  ;;  %v33_v48 = vadd.s32 24, %v30_v42 }
   0x5   :  { %v2828_v13 = vld [vmem:[%s3748_s3 + $0xe8] sm:$0xff]  ;;  %v2803_v15 = vld [vmem:[%s3748_s3 + $0x20] sm:$0xff]  ;;  %v2802_v21 = vld [vmem:[%s3748_s3 + $0x18] sm:$0xff]  ;;  %v34_v50 = vadd.s32 32, %v30_v42  ;;  %v35_v52 = vadd.s32 40, %v30_v42  ;;  %v36_v54 = vadd.s32 48, %v30_v42 }
   0x6   :  { %2901 = vmatpush.bf16.msra.mxu1 %v2805_v2  ;;  %2054 = vmatpush.bf16.msra.mxu0 %v2805_v2  ;;  %v379_v14 = vadd.f32 %v378_v11, %v2981_v9  ;;  %v3003_v16 = vld [vmem:[%s3749_s0 + $0x20] sm:$0xff]  ;;  %v3012_v19 = vld [vmem:[%s3749_s0 + $0x28] sm:$0xff]  ;;  %v3021_v22 = vld [vmem:[%s3749_s0 + $0x30] sm:$0xff]  ;;  %vm56_vm1 = vcmp.le.s32.totalorder %v32_v45, 16  ;;  %vm80_vm2 = vcmp.ge.s32.totalorder %v32_v45, 19  ;;  %vm43_vm3 = vcmp.ge.s32.totalorder %v31_v47, 10 }
   0x7   :  { %2112 = vmatpush.bf16.msra.mxu2 %v2821_v3  ;;  %v2819_v17 = vld [vmem:[%s3748_s3 + $0xa0] sm:$0xff]  ;;  %v2818_v23 = vld [vmem:[%s3748_s3 + $0x98] sm:$0xff]  ;;  %v2801_v27 = vld [vmem:[%s3748_s3 + $0x10] sm:$0xff]  ;;  %vm93_vm4 = vcmp.le.s32.totalorder %v33_v48, 25  ;;  %vm129_vm5 = vcmp.ge.s32.totalorder %v33_v48, 28  ;;  %vm142_vm7 = vcmp.le.s32.totalorder %v34_v50, 34 }
   0x8   :  { %2141 = vmatpush.bf16.msra.mxu3 %v2829_v5  ;;  %v380_v18 = vadd.f32 %v379_v14, %v2991_v12  ;;  %v3030_v25 = vld [vmem:[%s3749_s0 + $0x38] sm:$0xff]  ;;  %v3039_v28 = vld [vmem:[%s3749_s0 + $0x40] sm:$0xff]  ;;  %v2817_v29 = vld [vmem:[%s3748_s3 + $0x90] sm:$0xff]  ;;  %vm178_vm8 = vcmp.ge.s32.totalorder %v34_v50, 37  ;;  %vm191_vm10 = vcmp.le.s32.totalorder %v35_v52, 43  ;;  %vm227_vm11 = vcmp.ge.s32.totalorder %v35_v52, 46 }
   0x9   :  { %v3048_v31 = vld [vmem:[%s3749_s0 + $0x48] sm:$0xff]  ;;  %v3053_v32 = vld [vmem:[%s3749_s0 + $0x58] sm:$0x3]  ;;  %v3062_v35 = vld [vmem:[%s3749_s0 + $0x50] sm:$0xff]  ;;  %v3071_v57 = vsel %vm43_vm3, 1.0, %v2921_v56  ;;  %v37_v63 = vadd.s32 56, %v30_v42 }
   0xa   :  { %2902 = vmatpush.bf16.msra.mxu1 %v2804_v7  ;;  %2055 = vmatpush.bf16.msra.mxu0 %v2804_v7  ;;  %v381_v20 = vadd.f32 %v380_v18, %v3003_v16  ;;  %v2800_v34 = vld [vmem:[%s3748_s3 + $0x8] sm:$0xff]  ;;  %v389_v37 = vsel %vm388_vm0, %v3053_v32, 0.0  ;;  %v2799_v40 = vld [vmem:[%s3748_s3] sm:$0xff]  ;;  %vm116_vm6 = vmor %vm56_vm1, %vm80_vm2  ;;  %vm240_vm13 = vcmp.le.s32.totalorder %v36_v54, 52  ;;  %vm276_vm14 = vcmp.ge.s32.totalorder %v36_v54, 55 }
   0xb   :  { %2113 = vmatpush.bf16.msra.mxu2 %v2820_v10  ;;  %vm165_vm9 = vmor %vm93_vm4, %vm129_vm5  ;;  %v3073_v58 = vsel %vm116_vm6, 1.0, %v2921_v56  ;;  %v38_v5 = vadd.s32 64, %v30_v42  ;;  %vm289_vm2 = vcmp.le.s32.totalorder %v37_v63, 61 }
   0xc   :  { %2142 = vmatpush.bf16.msra.mxu3 %v2828_v13  ;;  %v382_v24 = vadd.f32 %v381_v20, %v3012_v19  ;;  %vm214_vm12 = vmor %vm142_vm7, %vm178_vm8  ;;  %v3079_v0 = vsel %vm165_vm9, 1.0, %v2921_v56  ;;  %v3116_v20 = vsel %vm289_vm2, 1.0, %v2921_v56  ;;  %vm691_vm7 = vcmask 1042432  }
   0xd   :  { %vm263_vm15 = vmor %vm191_vm10, %vm227_vm11  ;;  %vm338_vm3 = vcmp.le.s32.totalorder %v38_v5, 70  ;;  %vm692_vm8 = vcmask 1046532   ;;  %vm570_vm10 = vsmask.f32 3328  ;;  %vm571_vm11 = vsmask.f32 7440 }
   0xe   :  { %2903 = vmatpush.bf16.msra.mxu1 %v2803_v15  ;;  %2056 = vmatpush.bf16.msra.mxu0 %v2803_v15  ;;  %v383_v26 = vadd.f32 %v382_v24, %v3021_v22  ;;  %vm312_vm1 = vmor %vm240_vm13, %vm276_vm14  ;;  %vm912_vm13 = vsmask.f32 2304  ;;  %vm913_vm14 = vsmask.f32 6416 }
   0xf   :  { %2114 = vmatpush.bf16.msra.mxu2 %v2819_v17  ;;  %v3108_v15 = vsel %vm312_vm1, 1.0, %v2921_v56  ;;  %vm3255_vm9 = vmor %vm691_vm7, %vm692_vm8  ;;  %vm1210_vm1 = vcmask 1045508  }
  0x10   :  { %v384_v30 = vadd.f32 %v383_v26, %v3030_v25  ;;  %v3124_v26 = vsel %vm338_vm3, 1.0, %v2921_v56  ;;  %vm3591_vm2 = vmor %vm388_vm0, %vm1210_vm1 }
  0x12   :  { %2904 = vmatpush.bf16.msra.mxu1 %v2802_v21  ;;  %2057 = vmatpush.bf16.msra.mxu0 %v2802_v21  ;;  %v385_v33 = vadd.f32 %v384_v30, %v3039_v28 }
  0x13   :  { %2115 = vmatpush.bf16.msra.mxu2 %v2818_v23 }
  0x14   :  { %v386_v36 = vadd.f32 %v385_v33, %v3048_v31 }
  0x16   :  { %2905 = vmatpush.bf16.msra.mxu1 %v2801_v27  ;;  %2058 = vmatpush.bf16.msra.mxu0 %v2801_v27  ;;  %v387_v39 = vadd.f32 %v386_v36, %v3062_v35 }
  0x17   :  { %2116 = vmatpush.bf16.msra.mxu2 %v2817_v29 }
  0x18   :  { %v390_v41 = vadd.f32 %v389_v37, %v387_v39 }
  0x1a   :  { %2906 = vmatpush.bf16.msra.mxu1 %v2800_v34  ;;  %2059 = vmatpush.bf16.msra.mxu0 %v2800_v34  ;;  %v391_v43 = vrot.slane %v390_v41, 4 }
  0x1c   :  { %v392_v44 = vadd.f32 %v391_v43, %v390_v41 }
  0x1e   :  { %2907 = vmatpush.bf16.msra.mxu1 %v2799_v40  ;;  %2060 = vmatpush.bf16.msra.mxu0 %v2799_v40  ;;  %v393_v46 = vrot.slane %v392_v44, 2 }
  0x20   :  { %v394_v49 = vadd.f32 %v393_v46, %v392_v44 }
  0x22   :  { %v395_v51 = vrot.slane %v394_v49, 1 }
  0x24   :  { %v396_v53 = vadd.f32 %v395_v51, %v394_v49 }
  0x26   :  { %v397_v55 = vmul.f32 0.020408163, %v396_v53 }
  0x28   :  { %v398_v59 = vsub.f32 %v2968_v6, %v397_v55  ;;  %v399_v60 = vsub.f32 %v2976_v8, %v397_v55  ;;  %v400_v61 = vsub.f32 %v2981_v9, %v397_v55  ;;  %v401_v62 = vsub.f32 %v2991_v12, %v397_v55 }
  0x29   :  { %v402_v1 = vsub.f32 %v3003_v16, %v397_v55  ;;  %v3090_v6 = vsel %vm214_vm12, 1.0, %v2921_v56  ;;  %v403_v7 = vsub.f32 %v3012_v19, %v397_v55  ;;  %v3096_v9 = vsel %vm263_vm15, 1.0, %v2921_v56  ;;  %vm3285_vm12 = vmor %vm570_vm10, %vm571_vm11 }
  0x2a   :  { %v3082_v2 = vmul.f32 0.0, %v398_v59  ;;  %v3085_v3 = vmul.f32 %v399_v60, %v3071_v57  ;;  %v3088_v4 = vmul.f32 %v400_v61, %v3073_v58  ;;  %v3094_v8 = vmul.f32 %v401_v62, %v3079_v0  ;;  %vm3559_vm15 = vmor %vm912_vm13, %vm913_vm14 }
  0x2b   :  { %v404_v12 = vsub.f32 %v3021_v22, %v397_v55  ;;  %v3104_v13 = vmul.f32 %v402_v1, %v3090_v6  ;;  %v405_v16 = vsub.f32 %v3030_v25, %v397_v55  ;;  %v3112_v17 = vmul.f32 %v403_v7, %v3096_v9  ;;  %v453_v7 = vld [vmem:[%s3751_s1] sm:$0x1] }
  0x2c   :  { %v422_v10 = vmul.f32 %v3082_v2, %v3082_v2  ;;  %v423_v11 = vmul.f32 %v3085_v3, %v3085_v3  ;;  %v424_v14 = vmul.f32 %v3088_v4, %v3088_v4  ;;  %v425_v18 = vmul.f32 %v3094_v8, %v3094_v8 }
  0x2d   :  { %v406_v21 = vsub.f32 %v3039_v28, %v397_v55  ;;  %v3120_v22 = vmul.f32 %v404_v12, %v3108_v15  ;;  %v426_v23 = vmul.f32 %v3104_v13, %v3104_v13  ;;  %v407_v25 = vsub.f32 %v3048_v31, %v397_v55 }
  0x2e   :  { %v434_v19 = vadd.f32 %v423_v11, %v422_v10  ;;  %v3128_v27 = vmul.f32 %v405_v16, %v3116_v20  ;;  %v427_v29 = vmul.f32 %v3112_v17, %v3112_v17  ;;  %v409_v28 = vsub.f32 %v3053_v32, %v397_v55  ;;  %v2816_v16 = vld [vmem:[%s3748_s3 + $0x88] sm:$0xff] }
  0x2f   :  { %v408_v33 = vsub.f32 %v3062_v35, %v397_v55  ;;  %v3135_v34 = vmul.f32 %v406_v21, %v3124_v26  ;;  %v428_v36 = vmul.f32 %v3120_v22, %v3120_v22  ;;  %v3139_v38 = vmul.f32 0.0, %v407_v25  ;;  %v3169_v21 = vld [vmem:[%s3750_s2] ss:$0 sm:$0xff]  ;;  %2117 = vmatpush.bf16.msra.mxu2 %v2816_v16  ;;  %v2826_v25 = vld [vmem:[%s3748_s3 + $0xd8] sm:$0xff] }
  0x30   :  { %v435_v24 = vadd.f32 %v434_v19, %v424_v14  ;;  %v429_v31 = vmul.f32 %v3128_v27, %v3128_v27  ;;  %v421_v40 = vmul.f32 0.0, %v409_v28  ;;  %v2814_v14 = vld [vmem:[%s3748_s3 + $0x78] sm:$0xff] }
  0x31   :  { %v3143_v41 = vmul.f32 0.0, %v408_v33  ;;  %v430_v32 = vmul.f32 %v3135_v34, %v3135_v34  ;;  %v431_v42 = vmul.f32 %v3139_v38, %v3139_v38  ;;  %2082 = vmatpush.bf16.msrb.mxu1 %v2814_v14 }
  0x32   :  { %v436_v30 = vadd.f32 %v435_v24, %v425_v18  ;;  %v433_v44 = vmul.f32 %v421_v40, %v421_v40  ;;  %v2827_v18 = vld [vmem:[%s3748_s3 + $0xe0] sm:$0xff] }
  0x33   :  { %v432_v45 = vmul.f32 %v3143_v41, %v3143_v41  ;;  %v2815_v24 = vld [vmem:[%s3748_s3 + $0x80] sm:$0xff]  ;;  %2143 = vmatpush.bf16.msra.mxu3 %v2827_v18 }
  0x34   :  { %v437_v37 = vadd.f32 %v436_v30, %v426_v23  ;;  %v444_v48 = vsel %vm388_vm0, %v433_v44, 0.0  ;;  %v2813_v23 = vld [vmem:[%s3748_s3 + $0x70] sm:$0xff]  ;;  %2118 = vmatpush.bf16.msra.mxu2 %v2815_v24  ;;  %vm2314_vm0 = vcmask 261120  }
  0x35   :  { %2083 = vmatpush.bf16.msrb.mxu1 %v2813_v23 }
  0x36   :  { %v438_v39 = vadd.f32 %v437_v37, %v427_v29  ;;  %v2838_v29 = vld [vmem:[%s3748_s3 + $0x138] sm:$0xff] }
  0x37   :  { %2169 = vmatpush.bf16.msrb.mxu0 %v2838_v29  ;;  %2144 = vmatpush.bf16.msra.mxu3 %v2826_v25 }
  0x38   :  { %v439_v35 = vadd.f32 %v438_v39, %v428_v36 }
  0x3a   :  { %v440_v43 = vadd.f32 %v439_v35, %v429_v31  ;;  %v2825_v35 = vld [vmem:[%s3748_s3 + $0xd0] sm:$0xff] }
  0x3b   :  { %2145 = vmatpush.bf16.msra.mxu3 %v2825_v35 }
  0x3c   :  { %v441_v46 = vadd.f32 %v440_v43, %v430_v32 }
  0x3e   :  { %v442_v47 = vadd.f32 %v441_v46, %v431_v42  ;;  %v2837_v42 = vld [vmem:[%s3748_s3 + $0x130] sm:$0xff] }
  0x3f   :  { %2170 = vmatpush.bf16.msrb.mxu0 %v2837_v42 }
  0x40   :  { %v443_v49 = vadd.f32 %v442_v47, %v432_v45 }
  0x42   :  { %v445_v50 = vadd.f32 %v444_v48, %v443_v49 }
  0x44   :  { %v446_v51 = vrot.slane %v445_v50, 4 }
  0x46   :  { %v447_v52 = vadd.f32 %v446_v51, %v445_v50  ;;  %v2811_v50 = vld [vmem:[%s3748_s3 + $0x60] sm:$0xff]  ;;  %v2836_v51 = vld [vmem:[%s3748_s3 + $0x128] sm:$0xff] }
  0x47   :  { %2171 = vmatpush.bf16.msrb.mxu0 %v2836_v51 }
  0x48   :  { %v448_v53 = vrot.slane %v447_v52, 2 }
  0x4a   :  { %v449_v54 = vadd.f32 %v448_v53, %v447_v52 }
  0x4c   :  { %v450_v55 = vrot.slane %v449_v54, 1 }
  0x4e   :  { %v451_v56 = vadd.f32 %v450_v55, %v449_v54 }
  0x50   :  { %v452_v59 = vmul.f32 0.020408163, %v451_v56 }
  0x52   :  { %v454_v60 = vadd.f32 1e-05, %v452_v59 }
  0x54   :  { %2918 = vrsqrt.f32 %v454_v60  ;;  %vm461_vm4 = vweird.f32 %v454_v60 }
  0x5a   :  { %v2919_v61 = vpop.eup %2918 }
  0x5b   :  { %v456_v62 = vmul.f32 %v2919_v61, %v454_v60  ;;  %vm462_vm5 = vweird.f32 %v2919_v61 }
  0x5c   :  { %vm463_vm6 = vmor %vm461_vm4, %vm462_vm5 }
  0x5d   :  { %v457_v63 = vmul.f32 %v2919_v61, %v456_v62 }
  0x5f   :  { %v458_v1 = vmul.f32 0.5, %v457_v63  ;;  %v2854_v63 = vld [vmem:[%s3748_s3 + $0x1b8] sm:$0xff] }
  0x60   :  { %2227 = vmatpush.bf16.msrb.mxu2 %v2854_v63 }
  0x61   :  { %v459_v5 = vsub.f32 1.5, %v458_v1  ;;  %v2823_v1 = vld [vmem:[%s3748_s3 + $0xc0] sm:$0xff] }
  0x63   :  { %v460_v10 = vmul.f32 %v2919_v61, %v459_v5 }
  0x65   :  { %v464_v11 = vsel %vm463_vm6, %v2919_v61, %v460_v10 }
  0x66   :  { %v465_v12 = vmul.f32 %v464_v11, %v453_v7  ;;  %v2834_v7 = vld [vmem:[%s3748_s3 + $0x118] sm:$0xff] }
  0x68   :  { %v3164_v19 = vperm.slane %v465_v12, 0  ;;  %v2808_v12 = vld [vmem:[%s3748_s3 + $0x48] sm:$0xff] }
  0x6a   :  { %v473_v30 = vmul.f32 %v3164_v19, %v3104_v13  ;;  %v474_v28 = vmul.f32 %v3164_v19, %v3112_v17  ;;  %v469_v33 = vmul.f32 %v3164_v19, %v3082_v2  ;;  %v470_v36 = vmul.f32 %v3164_v19, %v3085_v3  ;;  %v2812_v2 = vld [vmem:[%s3748_s3 + $0x68] sm:$0xff] }
  0x6b   :  { %v471_v37 = vmul.f32 %v3164_v19, %v3088_v4  ;;  %v472_v31 = vmul.f32 %v3164_v19, %v3094_v8  ;;  %v475_v39 = vmul.f32 %v3164_v19, %v3120_v22  ;;  %v476_v43 = vmul.f32 %v3164_v19, %v3128_v27  ;;  %2084 = vmatpush.bf16.msrb.mxu1 %v2812_v2 }
  0x6c   :  { %v489_v13 = vadd.f32 %v3169_v21, %v473_v30  ;;  %v490_v17 = vadd.f32 %v3169_v21, %v474_v28  ;;  %v485_v3 = vadd.f32 %v3169_v21, %v469_v33  ;;  %v486_v4 = vadd.f32 %v3169_v21, %v470_v36 }
  0x6d   :  { %v487_v8 = vadd.f32 %v3169_v21, %v471_v37  ;;  %v488_v40 = vadd.f32 %v3169_v21, %v472_v31  ;;  %v491_v27 = vadd.f32 %v3169_v21, %v475_v39  ;;  %v492_v56 = vadd.f32 %v3169_v21, %v476_v43  ;;  %v2853_v37 = vld [vmem:[%s3748_s3 + $0x1b0] sm:$0xff] }
  0x6e   :  { %v501_v22 = vmax.f32 %v489_v13, 0.0  ;;  %v502_v32 = vmax.f32 %v490_v17, 0.0  ;;  %v497_v44 = vmax.f32 %v485_v3, 0.0  ;;  %v498_v45 = vmax.f32 %v486_v4, 0.0  ;;  %v2833_v3 = vld [vmem:[%s3748_s3 + $0x110] sm:$0xff]  ;;  %2228 = vmatpush.bf16.msrb.mxu2 %v2853_v37 }
  0x6f   :  { %v499_v46 = vmax.f32 %v487_v8, 0.0  ;;  %v500_v47 = vmax.f32 %v488_v40, 0.0  ;;  %v503_v59 = vmax.f32 %v491_v27, 0.0  ;;  %2085 = vmatpush.bf16.msrb.mxu1 %v2811_v50  ;;  %v504_v62 = vmax.f32 %v492_v56, 0.0 }
  0x70   :  { %v513_v48 = vmul.f32 %v501_v22, %v3090_v6  ;;  %v514_v49 = vmul.f32 %v502_v32, %v3096_v9  ;;  %v509_v52 = vmul.f32 0.0, %v497_v44  ;;  %v510_v53 = vmul.f32 %v498_v45, %v3071_v57  ;;  %v2824_v9 = vld [vmem:[%s3748_s3 + $0xc8] sm:$0xff] }
  0x71   :  { %v511_v54 = vmul.f32 %v499_v46, %v3073_v58  ;;  %v512_v6 = vmul.f32 %v500_v47, %v3079_v0  ;;  %v515_v57 = vmul.f32 %v503_v59, %v3108_v15  ;;  %2146 = vmatpush.bf16.msra.mxu3 %v2824_v9  ;;  %v516_v58 = vmul.f32 %v504_v62, %v3116_v20  ;;  %v2810_v0 = vld [vmem:[%s3748_s3 + $0x58] sm:$0xff]  ;;  %v2835_v15 = vld [vmem:[%s3748_s3 + $0x120] sm:$0xff]  ;;  %v2809_v20 = vld [vmem:[%s3748_s3 + $0x50] sm:$0xff] }
  0x72   :  { %v2884_v55 = vpack.c.bf16 %v514_v49, %v513_v48  ;;  %v2874_v60 = vpack.c.bf16 %v510_v53, %v509_v52  ;;  %2172 = vmatpush.bf16.msrb.mxu0 %v2835_v15 }
  0x73   :  { %v2879_v61 = vpack.c.bf16 %v512_v6, %v511_v54  ;;  %v2889_v5 = vpack.c.bf16 %v516_v58, %v515_v57  ;;  %2086 = vmatpush.bf16.msrb.mxu1 %v2810_v0  ;;  %v2807_v6 = vld [vmem:[%s3748_s3 + $0x40] sm:$0xff]  ;;  %v2864_v57 = vld [vmem:[%s3748_s3 + $0x208] sm:$0xff] }
  0x74   :  { %2897 = vst [vmem:[#allocation2 + $0x10] sm:$0xff] %v2884_v55  }
  0x75   :  { %2875 = vst [vmem:[#allocation2] sm:$0xff] %v2874_v60   ;;  %2147 = vmatpush.bf16.msra.mxu3 %v2823_v1  ;;  %v2862_v60 = vld [vmem:[%s3748_s3 + $0x1f8] sm:$0xff] }
  0x76   :  { %2896 = vst [vmem:[#allocation2 + $0x8] sm:$0xff] %v2879_v61   ;;  %2173 = vmatpush.bf16.msrb.mxu0 %v2834_v7  ;;  %v2832_v61 = vld [vmem:[%s3748_s3 + $0x108] sm:$0xff] }
  0x77   :  { %2898 = vst [vmem:[#allocation2 + $0x18] sm:$0xff] %v2889_v5   ;;  %2087 = vmatpush.bf16.msrb.mxu1 %v2809_v20 }
  0x79   :  { %2256 = vmatpush.bf16.msrb.mxu3 %v2862_v60 }
  0x7a   :  { %2174 = vmatpush.bf16.msrb.mxu0 %v2833_v3 }
  0x7b   :  { %v549_v10 = vld [vmem:[#allocation2 + $0x10] sm:$0xf]  ;;  %v550_v11 = vld [vmem:[#allocation2 + $0x14] sm:$0xf]  ;;  %2088 = vmatpush.bf16.msrb.mxu1 %v2808_v12 }
  0x7c   :  { %557 = vst [vmem:[#allocation3 + $0x90] sm:$0xf] %v549_v10  ;;  %v3253_v14 = vld [vmem:[#allocation2 + $0x10] sm:$0xf]  ;;  %v545_v16 = vld [vmem:[#allocation2] sm:$0xf] }
  0x7d   :  { %558 = vst [vmem:[#allocation3 + $0xb4] sm:$0xf] %v550_v11  ;;  %v546_v18 = vld [vmem:[#allocation2 + $0x4] sm:$0xf]  ;;  %v673_v23 = vld [vmem:[#allocation2] sm:$0xe] }
  0x7e   :  { %553 = vst [vmem:[#allocation3] sm:$0xf] %v545_v16  ;;  %v674_v24 = vld [vmem:[#allocation2 + $0x4] sm:$0xf]  ;;  %v675_v29 = vld [vmem:[#allocation2 + $0x8] sm:$0xf]  ;;  %2175 = vmatpush.bf16.msrb.mxu0 %v2832_v61 }
  0x7f   :  { %554 = vst [vmem:[#allocation3 + $0x24] sm:$0xf] %v546_v18  ;;  %v2327_v30 = vrot.slane %v673_v23, 9  ;;  %v696_v28 = vrot.slane %v674_v24, 5  ;;  %v699_v33 = vrot.slane %v675_v29, 5  ;;  %v705_v36 = vrot.slane %v3253_v14, 5  ;;  %2089 = vmatpush.bf16.msrb.mxu1 %v2807_v6 }
  0x80   :  { %v551_v13 = vld [vmem:[#allocation2 + $0x18] sm:$0xf]  ;;  %v552_v17 = vld [vmem:[#allocation2 + $0x1c] sm:$0xf]  ;;  %v547_v2 = vld [vmem:[#allocation2 + $0x8] sm:$0xf] }
  0x81   :  { %v697_v31 = vsel %vm3255_vm9, %v2327_v30, %v696_v28  ;;  %v698_v39 = vrot.slane %v696_v28, 4  ;;  %v548_v4 = vld [vmem:[#allocation2 + $0xc] sm:$0xf]  ;;  %v735_v8 = vld [vmem:[#allocation2 + $0x4] sm:$0xf]  ;;  %v701_v59 = vrot.slane %v699_v33, 4 }
  0x82   :  { %727 = vst [vmem:[#allocation3 + $0x8] sm:$0xf] %v697_v31  ;;  %v736_v40 = vld [vmem:[#allocation2 + $0x8] sm:$0xf]  ;;  %v3270_v35 = vld [vmem:[#allocation2 + $0xc] sm:$0xf] }
  0x83   :  { %v2405_v22 = vld [vmem:[#allocation3 + $0x90] sm:$0xf]  ;;  %v700_v32 = vsel %vm3255_vm9, %v698_v39, %v699_v33  ;;  %559 = vst [vmem:[#allocation3 + $0xd8] sm:$0xf] %v551_v13  ;;  %v745_v43 = vshrl.u32 %v735_v8, 16  ;;  %v748_v44 = vshll.u32 %v735_v8, 16 }
  0x84   :  { %v2785_v42 = vld [vmem:[#allocation3 + $0xb0] sm:$0xf0]  ;;  %728 = vst [vmem:[#allocation3 + $0x2c] sm:$0xf] %v700_v32  ;;  %v754_v47 = vshll.u32 %v736_v40, 16  ;;  %v758_v48 = vshrl.u32 %v736_v40, 16 }
  0x85   :  { %v2406_v45 = vor.u32 %v2785_v42, %v2405_v22  ;;  %v2333_v46 = vld [vmem:[#allocation3] sm:$0xf]  ;;  %560 = vst [vmem:[#allocation3 + $0xfc] sm:$0xf] %v552_v17  ;;  %v747_v50 = vrot.slane %v745_v43, 4  ;;  %v750_v51 = vrot.slane %v748_v44, 5 }
  0x86   :  { %v2767_v49 = vld [vmem:[#allocation3 + $0x20] sm:$0xf0]  ;;  %555 = vst [vmem:[#allocation3 + $0x48] sm:$0xf] %v547_v2  ;;  %v756_v52 = vrot.slane %v754_v47, 5  ;;  %v760_v53 = vrot.slane %v758_v48, 4 }
  0x87   :  { %2071 = vmatmul.bf16.vlgmr.msra.gmra.mxu1 %v2406_v45  ;;  %v2334_v27 = vor.u32 %v2767_v49, %v2333_v46  ;;  %556 = vst [vmem:[#allocation3 + $0x6c] sm:$0xf] %v548_v4  ;;  %v764_v54 = vshll.u32 %v3270_v35, 16  ;;  %v751_v9 = vor.u32 %v750_v51, %v747_v50  ;;  %v768_v55 = vshrl.u32 %v3270_v35, 16  ;;  %v676_v56 = vld [vmem:[#allocation2 + $0xc] sm:$0xf] }
  0x88   :  { %v761_v58 = vor.u32 %v760_v53, %v756_v52  ;;  %v702_v63 = vrot.slane %v676_v56, 5  ;;  %v561_v1 = vld [vmem:[#allocation2] sm:$0xf]  ;;  %v562_v20 = vld [vmem:[#allocation2 + $0x4] sm:$0xf]  ;;  %v2846_v17 = vld [vmem:[%s3748_s3 + $0x178] sm:$0xff] }
  0x89   :  { %2061 = vmatmul.bf16.vlgmr.msra.gmra.mxu0 %v2334_v27  ;;  %v2341_v62 = vld [vmem:[#allocation3 + $0x8] sm:$0xf]  ;;  %v3289_v0 = vrot.slane %v764_v54, 5  ;;  %v752_v5 = vrot.slane %v751_v9, 4  ;;  %v574_v7 = vshrl.u32 %v561_v1, 16  ;;  %v577_v33 = vshll.u32 %v561_v1, 16  ;;  %2198 = vmatpush.bf16.msra.mxu1 %v2846_v17 }
  0x8a   :  { %v3291_v15 = vld [vmem:[#allocation3 + $0xd8] sm:$0xf]  ;;  %v762_v11 = vrot.slane %v761_v58, 4  ;;  %v703_v12 = vsel %vm3255_vm9, %v701_v59, %v702_v63  ;;  %v704_v16 = vrot.slane %v702_v63, 4  ;;  %v738_v23 = vld [vmem:[#allocation2 + $0x10] sm:$0xf] }
  0x8b   :  { %v2768_v10 = vld [vmem:[#allocation3 + $0x28] sm:$0xf0]  ;;  %v3295_v18 = vld [vmem:[#allocation2 + $0x8] sm:$0xf]  ;;  %v757_v30 = vsel %vm3285_vm12, %v752_v5, %v756_v52  ;;  %729 = vst [vmem:[#allocation3 + $0x50] sm:$0xf] %v703_v12 }
  0x8c   :  { %v2342_v24 = vor.u32 %v2768_v10, %v2341_v62  ;;  %v3297_v29 = vld [vmem:[#allocation3 + $0xf8] sm:$0xf0]  ;;  %v576_v28 = vrot.slane %v574_v7, 4  ;;  %v767_v31 = vsel %vm3285_vm12, %v762_v11, %v3289_v0  ;;  %836 = vst [vmem:[#allocation3 + $0xc] sm:$0xf] %v757_v30  ;;  %v706_v39 = vsel %vm3255_vm9, %v704_v16, %v705_v36  ;;  %v2831_v42 = vld [vmem:[%s3748_s3 + $0x100] sm:$0xff] }
  0x8d   :  { %v3301_v37 = vld [vmem:[#allocation3 + $0x48] sm:$0xf]  ;;  %v583_v13 = vshll.u32 %v562_v20, 16  ;;  %837 = vst [vmem:[#allocation3 + $0x30] sm:$0xf] %v767_v31  ;;  %v579_v3 = vrot.slane %v577_v33, 5  ;;  %v2442_v8 = vor.u32 %v3297_v29, %v3291_v15  ;;  %2176 = vmatpush.bf16.msrb.mxu0 %v2831_v42  ;;  %v477_v42 = vmul.f32 %v3164_v19, %v3135_v34 }
  0x8e   :  { %2119 = vmatmul.bf16.vlgmr.msra.gmra.mxu2 %v2342_v24  ;;  %v3313_v2 = vld [vmem:[#allocation3 + $0x68] sm:$0xf0]  ;;  %v587_v4 = vshrl.u32 %v562_v20, 16  ;;  %730 = vst [vmem:[#allocation3 + $0x74] sm:$0xf] %v706_v39  ;;  %v593_v32 = vshll.u32 %v3295_v18, 16 }
  0x8f   :  { %v2370_v40 = vor.u32 %v3313_v2, %v3301_v37  ;;  %v585_v22 = vrot.slane %v583_v13, 5  ;;  %v2852_v35 = vld [vmem:[%s3748_s3 + $0x1a8] sm:$0xff]  ;;  %v580_v43 = vor.u32 %v579_v3, %v576_v28  ;;  %v3326_v45 = vld [vmem:[#allocation2 + $0x14] sm:$0xf]  ;;  %v770_v46 = vrot.slane %v768_v55, 4  ;;  %v2851_v39 = vld [vmem:[%s3748_s3 + $0x1a0] sm:$0xff] }
  0x90   :  { %v589_v44 = vrot.slane %v587_v4, 4  ;;  %v774_v47 = vshll.u32 %v738_v23, 16  ;;  %v2861_v48 = vld [vmem:[%s3748_s3 + $0x1f0] sm:$0xff]  ;;  %v3331_v49 = vrot.slane %v593_v32, 5  ;;  %2229 = vmatpush.bf16.msrb.mxu2 %v2852_v35  ;;  %v778_v50 = vshrl.u32 %v738_v23, 16  ;;  %v2860_v13 = vld [vmem:[%s3748_s3 + $0x1e8] sm:$0xff] }
  0x91   :  { %v784_v51 = vshll.u32 %v3326_v45, 16  ;;  %v788_v27 = vshrl.u32 %v3326_v45, 16  ;;  %v844_v52 = vld [vmem:[#allocation2 + $0x4] sm:$0xe]  ;;  %v581_v53 = vrot.slane %v580_v43, 4  ;;  %v771_v6 = vor.u32 %v770_v46, %v3289_v0  ;;  %2257 = vmatpush.bf16.msrb.mxu3 %v2861_v48  ;;  %v2845_v0 = vld [vmem:[%s3748_s3 + $0x170] sm:$0xff] }
  0x92   :  { %v590_v54 = vor.u32 %v589_v44, %v585_v22  ;;  %v776_v9 = vrot.slane %v774_v47, 5  ;;  %v845_v55 = vld [vmem:[#allocation2 + $0x8] sm:$0xf]  ;;  %v3336_v56 = vld [vmem:[#allocation2 + $0xc] sm:$0xf]  ;;  %v780_v59 = vrot.slane %v778_v50, 4  ;;  %2199 = vmatpush.bf16.msra.mxu1 %v2845_v0  ;;  %v478_v48 = vmul.f32 %v3164_v19, %v3139_v38 }
  0x93   :  { %v3338_v60 = vrot.slane %v784_v51, 5  ;;  %v2328_v61 = vrot.slane %v844_v52, 9  ;;  %v864_v62 = vrot.slane %v845_v55, 5  ;;  %v2764_v58 = vld [vmem:[#allocation3 + $0xc] sm:$0xf]  ;;  %v586_v63 = vsel %vm3285_vm12, %v581_v53, %v585_v22  ;;  %v2844_v22 = vld [vmem:[%s3748_s3 + $0x168] sm:$0xff] }
  0x94   :  { %v591_v1 = vrot.slane %v590_v54, 4  ;;  %v772_v15 = vrot.slane %v771_v6, 4  ;;  %v867_v5 = vrot.slane %v3336_v56, 5  ;;  %v2343_v20 = vld [vmem:[#allocation3 + $0x2c] sm:$0xf0]  ;;  %v781_v10 = vor.u32 %v780_v59, %v776_v9  ;;  %2230 = vmatpush.bf16.msrb.mxu2 %v2851_v39  ;;  %v2850_v47 = vld [vmem:[%s3748_s3 + $0x198] sm:$0xff] }
  0x95   :  { %v2377_v7 = vld [vmem:[#allocation3 + $0x50] sm:$0xf]  ;;  %665 = vst [vmem:[#allocation3 + $0x4] sm:$0xf] %v586_v63  ;;  %v865_v11 = vsel %vm3255_vm9, %v2328_v61, %v864_v62  ;;  %v866_v12 = vrot.slane %v864_v62, 4  ;;  %v707_v16 = vrot.slane %v705_v36, 4  ;;  %v2346_v23 = vor.u32 %v2764_v58, %v2343_v20  ;;  %2258 = vmatpush.bf16.msrb.mxu3 %v2860_v13 }
  0x96   :  { %v2777_v24 = vld [vmem:[#allocation3 + $0x70] sm:$0xf0]  ;;  %v596_v29 = vsel %vm3285_vm12, %v591_v1, %v3331_v49  ;;  %v777_v30 = vsel %vm3285_vm12, %v772_v15, %v776_v9  ;;  %895 = vst [vmem:[#allocation3 + $0x10] sm:$0xf] %v865_v11  ;;  %v678_v28 = vld [vmem:[#allocation2 + $0x14] sm:$0xf]  ;;  %2200 = vmatpush.bf16.msra.mxu1 %v2844_v22  ;;  %v494_v1 = vadd.f32 %v3169_v21, %v478_v48 }
  0x97   :  { %2076 = vmatmul.bf16.gmra.mxu1 %v2442_v8  ;;  %666 = vst [vmem:[#allocation3 + $0x28] sm:$0xf] %v596_v29  ;;  %v782_v33 = vrot.slane %v781_v10, 4  ;;  %v868_v14 = vsel %vm3255_vm9, %v866_v12, %v867_v5  ;;  %v3359_v36 = vld [vmem:[#allocation2 + $0x18] sm:$0xf]  ;;  %v708_v37 = vrot.slane %v678_v28, 5  ;;  %2148 = vmatmul.bf16.vlgmr.msra.gmra.mxu3 %v2346_v23  ;;  %v2378_v32 = vor.u32 %v2777_v24, %v2377_v7 }
  0x98   :  { %838 = vst [vmem:[#allocation3 + $0x54] sm:$0xf] %v777_v30  ;;  %v711_v31 = vrot.slane %v3359_v36, 5  ;;  %v597_v17 = vshrl.u32 %v3295_v18, 16  ;;  %v564_v8 = vld [vmem:[#allocation2 + $0xc] sm:$0xf]  ;;  %2231 = vmatpush.bf16.msrb.mxu2 %v2850_v47 }
  0x99   :  { %2066 = vmatmul.bf16.gmra.mxu0 %v2370_v40  ;;  %v787_v2 = vsel %vm3285_vm12, %v782_v33, %v3338_v60  ;;  %896 = vst [vmem:[#allocation3 + $0x34] sm:$0xf] %v868_v14  ;;  %v709_v3 = vsel %vm3255_vm9, %v707_v16, %v708_v37  ;;  %v710_v4 = vrot.slane %v708_v37, 4  ;;  %v3377_v18 = vld [vmem:[#allocation2 + $0x10] sm:$0xf]  ;;  %v603_v35 = vshll.u32 %v564_v8, 16 }
  0x9a   :  { %839 = vst [vmem:[#allocation3 + $0x78] sm:$0xf] %v787_v2  ;;  %v599_v40 = vrot.slane %v597_v17, 4  ;;  %v607_v44 = vshrl.u32 %v564_v8, 16  ;;  %v613_v46 = vshll.u32 %v3377_v18, 16  ;;  %v790_v51 = vrot.slane %v788_v27, 4 }
  0x9b   :  { %v712_v43 = vsel %vm3255_vm9, %v710_v4, %v711_v31  ;;  %731 = vst [vmem:[#allocation3 + $0x98] sm:$0xf] %v709_v3  ;;  %v605_v50 = vrot.slane %v603_v35, 5  ;;  %v740_v6 = vld [vmem:[#allocation2 + $0x18] sm:$0xf]  ;;  %v617_v7 = vshrl.u32 %v3377_v18, 16 }
  0x9c   :  { %732 = vst [vmem:[#allocation3 + $0xbc] sm:$0xf] %v712_v43  ;;  %v600_v34 = vor.u32 %v599_v40, %v3331_v49  ;;  %v3394_v52 = vld [vmem:[#allocation3 + $0x4] sm:$0xf]  ;;  %v609_v53 = vrot.slane %v607_v44, 4  ;;  %v3396_v54 = vrot.slane %v613_v46, 5  ;;  %v791_v38 = vor.u32 %v790_v51, %v3338_v60 }
  0x9d   :  { %v3398_v59 = vld [vmem:[#allocation2 + $0x1c] sm:$0xf]  ;;  %v794_v61 = vshll.u32 %v740_v6, 16  ;;  %v493_v49 = vadd.f32 %v3169_v21, %v477_v42  ;;  %v798_v45 = vshrl.u32 %v740_v6, 16  ;;  %v847_v63 = vld [vmem:[#allocation2 + $0x10] sm:$0xf] }
  0x9e   :  { %2124 = vmatmul.bf16.gmra.mxu2 %v2378_v32  ;;  %v2335_v9 = vld [vmem:[#allocation3 + $0x24] sm:$0xf0]  ;;  %v601_v55 = vrot.slane %v600_v34, 4  ;;  %v610_v58 = vor.u32 %v609_v53, %v605_v50  ;;  %v804_v27 = vshll.u32 %v3398_v59, 16  ;;  %v2349_v15 = vld [vmem:[#allocation3 + $0x10] sm:$0xf] }
  0x9f   :  { %v2773_v62 = vld [vmem:[#allocation3 + $0x54] sm:$0xf]  ;;  %v792_v60 = vrot.slane %v791_v38, 4  ;;  %v796_v10 = vrot.slane %v794_v61, 5  ;;  %v2338_v12 = vor.u32 %v3394_v52, %v2335_v9  ;;  %v800_v24 = vrot.slane %v798_v45, 4  ;;  %v3427_v2 = vld [vmem:[%s3748_s3 + $0x238] sm:$0xff] }
  0xa0   :  { %v2769_v0 = vld [vmem:[#allocation3 + $0x30] sm:$0xf0]  ;;  %v606_v20 = vsel %vm3285_vm12, %v601_v55, %v605_v50  ;;  %v611_v23 = vrot.slane %v610_v58, 4  ;;  %v3413_v29 = vrot.slane %v804_v27, 5  ;;  %v808_v30 = vshrl.u32 %v3398_v59, 16  ;;  %v2849_v43 = vld [vmem:[%s3748_s3 + $0x190] sm:$0xff]  ;;  %2285 = vmatpush.bf16.msra.mxu0 %v3427_v2 }
  0xa1   :  { %v2859_v11 = vld [vmem:[%s3748_s3 + $0x1e0] sm:$0xff]  ;;  %v2379_v16 = vld [vmem:[#allocation3 + $0x74] sm:$0xf0]  ;;  %667 = vst [vmem:[#allocation3 + $0x4c] sm:$0xf] %v606_v20  ;;  %v797_v21 = vsel %vm3285_vm12, %v792_v60, %v796_v10  ;;  %v869_v33 = vrot.slane %v867_v5, 4  ;;  %v801_v37 = vor.u32 %v800_v24, %v796_v10  ;;  %v2350_v4 = vor.u32 %v2769_v0, %v2349_v15  ;;  %2232 = vmatpush.bf16.msrb.mxu2 %v2849_v43 }
  0xa2   :  { %v3416_v28 = vld [vmem:[#allocation2 + $0x14] sm:$0xf]  ;;  %2259 = vmatpush.bf16.msrb.mxu3 %v2859_v11  ;;  %v616_v14 = vsel %vm3285_vm12, %v611_v23, %v3396_v54  ;;  %840 = vst [vmem:[#allocation3 + $0x9c] sm:$0xf] %v797_v21  ;;  %v870_v39 = vrot.slane %v847_v63, 5  ;;  %v2382_v17 = vor.u32 %v2773_v62, %v2379_v16  ;;  %v505_v3 = vmax.f32 %v493_v49, 0.0 }
  0xa3   :  { %v873_v13 = vrot.slane %v3416_v28, 5  ;;  %668 = vst [vmem:[#allocation3 + $0x70] sm:$0xf] %v616_v14  ;;  %v506_v56 = vmax.f32 %v494_v1, 0.0  ;;  %v713_v5 = vrot.slane %v711_v31, 4  ;;  %v802_v32 = vrot.slane %v801_v37, 4 }
  0xa4   :  { %v2413_v8 = vld [vmem:[#allocation3 + $0x98] sm:$0xf]  ;;  %v2786_v22 = vld [vmem:[#allocation3 + $0xb8] sm:$0xf0]  ;;  %v871_v18 = vsel %vm3255_vm9, %v869_v33, %v870_v39  ;;  %v872_v40 = vrot.slane %v870_v39, 4  ;;  %v2843_v42 = vld [vmem:[%s3748_s3 + $0x160] sm:$0xff]  ;;  %v517_v36 = vmul.f32 %v505_v3, %v3124_v26 }
  0xa5   :  { %v680_v35 = vld [vmem:[#allocation2 + $0x1c] sm:$0xf]  ;;  %897 = vst [vmem:[#allocation3 + $0x58] sm:$0xf] %v871_v18  ;;  %v518_v31 = vmul.f32 0.0, %v506_v56  ;;  %v3447_v47 = vld [vmem:[%s3748_s3 + $0x230] sm:$0xff]  ;;  %v807_v48 = vsel %vm3285_vm12, %v802_v32, %v3413_v29  ;;  %2201 = vmatpush.bf16.msra.mxu1 %v2843_v42  ;;  %v2414_v49 = vor.u32 %v2786_v22, %v2413_v8 }
  0xa6   :  { %v714_v44 = vrot.slane %v680_v35, 5  ;;  %v2858_v46 = vld [vmem:[%s3748_s3 + $0x1d8] sm:$0xff]  ;;  %v874_v34 = vsel %vm3255_vm9, %v872_v40, %v873_v13  ;;  %v566_v26 = vld [vmem:[#allocation2 + $0x14] sm:$0xf]  ;;  %v619_v51 = vrot.slane %v617_v7, 4  ;;  %v2848_v61 = vld [vmem:[%s3748_s3 + $0x188] sm:$0xff]  ;;  %2286 = vmatpush.bf16.msra.mxu0 %v3447_v47 }
  0xa7   :  { %2090 = vmatmul.bf16.vlgmr.msrb.gmra.mxu1 %v2338_v12  ;;  %v3454_v50 = vld [vmem:[#allocation2 + $0x18] sm:$0xf]  ;;  %2153 = vmatmul.bf16.gmra.mxu3 %v2382_v17  ;;  %841 = vst [vmem:[#allocation3 + $0xc0] sm:$0xf] %v807_v48  ;;  %v2894_v52 = vpack.c.bf16 %v518_v31, %v517_v36  ;;  %v623_v6 = vshll.u32 %v566_v26, 16  ;;  %v627_v59 = vshrl.u32 %v566_v26, 16 }
  0xa8   :  { %v715_v53 = vsel %vm3255_vm9, %v713_v5, %v714_v44  ;;  %v2842_v9 = vld [vmem:[%s3748_s3 + $0x158] sm:$0xff]  ;;  %898 = vst [vmem:[#allocation3 + $0x7c] sm:$0xf] %v874_v34  ;;  %2260 = vmatpush.bf16.msrb.mxu3 %v2858_v46  ;;  %v620_v55 = vor.u32 %v619_v51, %v3396_v54  ;;  %v633_v38 = vshll.u32 %v3454_v50, 16  ;;  %v716_v62 = vrot.slane %v714_v44, 4  ;;  %2233 = vmatpush.bf16.msrb.mxu2 %v2848_v61  ;;  %v2847_v54 = vld [vmem:[%s3748_s3 + $0x180] sm:$0xff] }
  0xa9   :  { %2177 = vmatmul.bf16.vlgmr.msrb.gmra.mxu0 %v2350_v4  ;;  %2899 = vst [vmem:[#allocation2 + $0x20] sm:$0xff] %v2894_v52   ;;  %v625_v58 = vrot.slane %v623_v6, 5  ;;  %v810_v45 = vrot.slane %v808_v30, 4  ;;  %v629_v63 = vrot.slane %v627_v59, 4  ;;  %v637_v1 = vshrl.u32 %v3454_v50, 16  ;;  %2202 = vmatpush.bf16.msra.mxu1 %v2842_v9  ;;  %v2857_v24 = vld [vmem:[%s3748_s3 + $0x1d0] sm:$0xff] }
  0xaa   :  { %733 = vst [vmem:[#allocation3 + $0xe0] sm:$0xf] %v715_v53  ;;  %v621_v27 = vrot.slane %v620_v55, 4  ;;  %v3471_v15 = vrot.slane %v633_v38, 5  ;;  %v849_v20 = vld [vmem:[#allocation2 + $0x18] sm:$0xf] }
  0xab   :  { %v811_v0 = vor.u32 %v810_v45, %v3413_v29  ;;  %v3474_v7 = vld [vmem:[#allocation2 + $0x1c] sm:$0xf]  ;;  %v875_v60 = vrot.slane %v873_v13, 4  ;;  %v630_v12 = vor.u32 %v629_v63, %v625_v58  ;;  %v876_v16 = vrot.slane %v849_v20, 5  ;;  %v3485_v21 = vld [vmem:[%s3748_s3 + $0x228] sm:$0xff]  ;;  %v2841_v28 = vld [vmem:[%s3748_s3 + $0x150] sm:$0xff] }
  0xac   :  { %v2772_v10 = vld [vmem:[#allocation3 + $0x4c] sm:$0xf]  ;;  %v626_v11 = vsel %vm3285_vm12, %v621_v27, %v625_v58  ;;  %v879_v23 = vrot.slane %v3474_v7, 5  ;;  %v2371_v29 = vld [vmem:[#allocation3 + $0x6c] sm:$0xf0]  ;;  %2234 = vmatpush.bf16.msrb.mxu2 %v2847_v54  ;;  %2261 = vmatpush.bf16.msrb.mxu3 %v2857_v24 }
  0xad   :  { %669 = vst [vmem:[#allocation3 + $0x94] sm:$0xf] %v626_v11  ;;  %v812_v30 = vrot.slane %v811_v0, 4  ;;  %v2782_v33 = vld [vmem:[#allocation3 + $0x9c] sm:$0xf]  ;;  %v631_v37 = vrot.slane %v630_v12, 4  ;;  %v877_v39 = vsel %vm3255_vm9, %v875_v60, %v876_v16  ;;  %2287 = vmatpush.bf16.msra.mxu0 %v3485_v21  ;;  %2203 = vmatpush.bf16.msra.mxu1 %v2841_v28  ;;  %v2374_v40 = vor.u32 %v2772_v10, %v2371_v29 }
  0xae   :  { %2129 = vmatmul.bf16.gmra.mxu2 %v2414_v49  ;;  %v2415_v14 = vld [vmem:[#allocation3 + $0xbc] sm:$0xf0]  ;;  %v878_v13 = vrot.slane %v876_v16, 4  ;;  %v1019_v17 = vld [vmem:[#allocation2 + $0x8] sm:$0xe]  ;;  %v2867_v52 = vld [vmem:[%s3748_s3 + $0x220] sm:$0xff] }
  0xaf   :  { %v2385_v3 = vld [vmem:[#allocation3 + $0x58] sm:$0xf]  ;;  %899 = vst [vmem:[#allocation3 + $0xa0] sm:$0xf] %v877_v39  ;;  %v1020_v56 = vld [vmem:[#allocation2 + $0xc] sm:$0xf]  ;;  %v636_v8 = vsel %vm3285_vm12, %v631_v37, %v3471_v15  ;;  %v2418_v48 = vor.u32 %v2782_v33, %v2415_v14 }
  0xb0   :  { %v3493_v5 = vld [vmem:[#allocation2 + $0x10] sm:$0xf]  ;;  %v681_v4 = vld [vmem:[#allocation2 + $0x20] sm:$0x1]  ;;  %v743_v32 = vld [vmem:[#allocation2 + $0x24] sm:$0x1]  ;;  %v880_v18 = vsel %vm3255_vm9, %v878_v13, %v879_v23  ;;  %2908 = vmatpush.bf16.msra.mxu2 %v3427_v2 }
  0xb1   :  { %v742_v22 = vld [vmem:[#allocation2 + $0x20] sm:$0xf]  ;;  %v2778_v35 = vld [vmem:[#allocation3 + $0x78] sm:$0xf0]  ;;  %v717_v42 = vrot.slane %v681_v4, 5  ;;  %v824_v31 = vshll.u32 %v743_v32, 16  ;;  %2288 = vmatpush.bf16.msra.mxu0 %v2867_v52 }
  0xb2   :  { %670 = vst [vmem:[#allocation3 + $0xb8] sm:$0xf] %v636_v8  ;;  %v814_v43 = vshll.u32 %v742_v22, 16  ;;  %v818_v36 = vshrl.u32 %v742_v22, 16  ;;  %v2329_v44 = vrot.slane %v1019_v17, 9  ;;  %v1039_v46 = vrot.slane %v1020_v56, 5 }
  0xb3   :  { %900 = vst [vmem:[#allocation3 + $0xc4] sm:$0xf] %v880_v18  ;;  %v718_v34 = vsel %vm3255_vm9, %v716_v62, %v717_v42  ;;  %v1042_v51 = vrot.slane %v3493_v5, 5  ;;  %v2856_v2 = vld [vmem:[%s3748_s3 + $0x1c8] sm:$0xff]  ;;  %v568_v53 = vld [vmem:[#allocation2 + $0x1c] sm:$0xf]  ;;  %v2386_v6 = vor.u32 %v2778_v35, %v2385_v3 }
  0xb4   :  { %v816_v26 = vrot.slane %v814_v43, 5  ;;  %734 = vst [vmem:[#allocation3 + $0x104] sm:$0xf] %v718_v34  ;;  %v820_v9 = vrot.slane %v818_v36, 4  ;;  %v1040_v55 = vsel %vm3255_vm9, %v2329_v44, %v1039_v46  ;;  %2909 = vmatpush.bf16.msra.mxu2 %v3447_v47  ;;  %v1041_v38 = vrot.slane %v1039_v46, 4  ;;  %2262 = vmatpush.bf16.msrb.mxu3 %v2856_v2  ;;  %v2840_v0 = vld [vmem:[%s3748_s3 + $0x148] sm:$0xff] }
  0xb5   :  { %1070 = vst [vmem:[#allocation3 + $0x18] sm:$0xf] %v1040_v55  ;;  %v569_v61 = vld [vmem:[#allocation2 + $0x20] sm:$0x1]  ;;  %v639_v49 = vrot.slane %v637_v1, 4  ;;  %v826_v58 = vrot.slane %v824_v31, 5  ;;  %2204 = vmatpush.bf16.msra.mxu1 %v2840_v0 }
  0xb6   :  { %v817_v59 = vsel %vm3285_vm12, %v812_v30, %v816_v26  ;;  %v821_v62 = vor.u32 %v820_v9, %v816_v26  ;;  %v643_v45 = vshll.u32 %v568_v53, 16  ;;  %v647_v27 = vshrl.u32 %v568_v53, 16  ;;  %v2855_v50 = vld [vmem:[%s3748_s3 + $0x1c0] sm:$0xff]  ;;  %v2866_v16 = vld [vmem:[%s3748_s3 + $0x218] sm:$0xff]  ;;  %v1078_v22 = vld [vmem:[#allocation2 + $0x8] sm:$0xe] }
  0xb7   :  { %2095 = vmatmul.bf16.gmra.mxu1 %v2374_v40  ;;  %842 = vst [vmem:[#allocation3 + $0xe4] sm:$0xf] %v817_v59  ;;  %2158 = vmatmul.bf16.gmra.mxu3 %v2418_v48  ;;  %v1043_v47 = vsel %vm3255_vm9, %v1041_v38, %v1042_v51  ;;  %v640_v63 = vor.u32 %v639_v49, %v3471_v15  ;;  %v653_v54 = vshll.u32 %v569_v61, 16  ;;  %v851_v1 = vld [vmem:[#allocation2 + $0x20] sm:$0xf]  ;;  %v881_v10 = vrot.slane %v879_v23, 4 }
  0xb8   :  { %v822_v20 = vrot.slane %v821_v62, 4  ;;  %1071 = vst [vmem:[#allocation3 + $0x3c] sm:$0xf] %v1043_v47  ;;  %v645_v60 = vrot.slane %v643_v45, 5  ;;  %2910 = vmatpush.bf16.msra.mxu2 %v3485_v21  ;;  %v2449_v15 = vld [vmem:[#allocation3 + $0xe0] sm:$0xf]  ;;  %2263 = vmatpush.bf16.msrb.mxu3 %v2855_v50 }
  0xb9   :  { %2182 = vmatmul.bf16.gmra.mxu0 %v2386_v6  ;;  %v641_v11 = vrot.slane %v640_v63, 4  ;;  %v649_v12 = vrot.slane %v647_v27, 4  ;;  %v852_v29 = vld [vmem:[#allocation2 + $0x24] sm:$0x1]  ;;  %v882_v30 = vrot.slane %v851_v1, 5  ;;  %v655_v33 = vrot.slane %v653_v54, 5 }
  0xba   :  { %v827_v24 = vsel %vm3285_vm12, %v822_v20, %v826_v58  ;;  %v2839_v7 = vld [vmem:[%s3748_s3 + $0x140] sm:$0xff]  ;;  %v885_v14 = vrot.slane %v852_v29, 5  ;;  %2289 = vmatpush.bf16.msra.mxu0 %v2866_v16  ;;  %v2407_v13 = vld [vmem:[#allocation3 + $0xb4] sm:$0xf0]  ;;  %v1044_v5 = vrot.slane %v1042_v51, 4  ;;  %v1088_v43 = vshrl.u32 %v1078_v22, 16 }
  0xbb   :  { %v2795_v23 = vld [vmem:[#allocation3 + $0x100] sm:$0xf0]  ;;  %843 = vst [vmem:[#allocation3 + $0x108] sm:$0xf] %v827_v24  ;;  %v646_v21 = vsel %vm3285_vm12, %v641_v11, %v645_v60  ;;  %v650_v28 = vor.u32 %v649_v12, %v645_v60  ;;  %v2781_v39 = vld [vmem:[#allocation3 + $0x94] sm:$0xf]  ;;  %v883_v17 = vsel %vm3255_vm9, %v881_v10, %v882_v30  ;;  %2205 = vmatpush.bf16.msra.mxu1 %v2839_v7 }
  0xbc   :  { %v2450_v37 = vor.u32 %v2795_v23, %v2449_v15  ;;  %671 = vst [vmem:[#allocation3 + $0xdc] sm:$0xf] %v646_v21  ;;  %v884_v3 = vrot.slane %v882_v30, 4  ;;  %2911 = vmatpush.bf16.msra.mxu2 %v2867_v52  ;;  %v1079_v32 = vld [vmem:[#allocation2 + $0xc] sm:$0xf]  ;;  %v1091_v36 = vshll.u32 %v1078_v22, 16  ;;  %v2410_v46 = vor.u32 %v2781_v39, %v2407_v13 }
  0xbd   :  { %v651_v56 = vrot.slane %v650_v28, 4  ;;  %901 = vst [vmem:[#allocation3 + $0xe8] sm:$0xf] %v883_v17  ;;  %v2421_v18 = vld [vmem:[#allocation3 + $0xa0] sm:$0xf]  ;;  %v1097_v31 = vshrl.u32 %v1079_v32, 16 }
  0xbe   :  { %2134 = vmatmul.bf16.gmra.mxu2 %v2450_v37  ;;  %v2791_v4 = vld [vmem:[#allocation3 + $0xe4] sm:$0xf]  ;;  %v886_v8 = vsel %vm3255_vm9, %v884_v3, %v885_v14  ;;  %v1080_v42 = vld [vmem:[#allocation2 + $0x10] sm:$0xf]  ;;  %v1100_v48 = vshll.u32 %v1079_v32, 16  ;;  %v1090_v52 = vrot.slane %v1088_v43, 5 }
  0xbf   :  { %v2787_v40 = vld [vmem:[#allocation3 + $0xc0] sm:$0xf0]  ;;  %v656_v35 = vsel %vm3285_vm12, %v651_v56, %v655_v33  ;;  %902 = vst [vmem:[#allocation3 + $0x10c] sm:$0xf] %v886_v8  ;;  %v1107_v34 = vshrl.u32 %v1080_v42, 16  ;;  %v1110_v26 = vshll.u32 %v1080_v42, 16 }
  0xc0   :  { %672 = vst [vmem:[#allocation3 + $0x100] sm:$0xf] %v656_v35  ;;  %v2865_v44 = vld [vmem:[%s3748_s3 + $0x210] sm:$0xff]  ;;  %2912 = vmatpush.bf16.msra.mxu2 %v2866_v16  ;;  %v1093_v53 = vrot.slane %v1091_v36, 6  ;;  %v1099_v6 = vrot.slane %v1097_v31, 5  ;;  %v1102_v59 = vrot.slane %v1100_v48, 6  ;;  %v2422_v49 = vor.u32 %v2787_v40, %v2421_v18 }
  0xc1   :  { %v1022_v51 = vld [vmem:[#allocation2 + $0x14] sm:$0xf]  ;;  %2290 = vmatpush.bf16.msra.mxu0 %v2865_v44  ;;  %v1109_v38 = vrot.slane %v1107_v34, 5  ;;  %v1112_v61 = vrot.slane %v1110_v26, 6  ;;  %v3553_v58 = vld [vmem:[#allocation2 + $0x18] sm:$0xf]  ;;  %v479_v48 = vmul.f32 %v3164_v19, %v3143_v41 }
  0xc2   :  { %v2451_v2 = vld [vmem:[#allocation3 + $0x104] sm:$0xf0]  ;;  %v1045_v9 = vrot.slane %v1022_v51, 5  ;;  %v1094_v62 = vor.u32 %v1093_v53, %v1090_v52  ;;  %v1103_v63 = vor.u32 %v1102_v59, %v1099_v6  ;;  %v1048_v0 = vrot.slane %v3553_v58, 5  ;;  %v903_v50 = vld [vmem:[#allocation2 + $0x4] sm:$0xe] }
  0xc3   :  { %v2454_v55 = vor.u32 %v2791_v4, %v2451_v2  ;;  %v3563_v54 = vor.u32 %v1112_v61, %v1109_v38  ;;  %v2357_v1 = vld [vmem:[#allocation3 + $0x18] sm:$0xf]  ;;  %v916_v10 = vshrl.u32 %v903_v50, 16  ;;  %v2770_v15 = vld [vmem:[#allocation3 + $0x38] sm:$0xf0]  ;;  %v919_v24 = vshll.u32 %v903_v50, 16 }
  0xc4   :  { %v1046_v45 = vsel %vm3255_vm9, %v1044_v5, %v1045_v9  ;;  %v1047_v27 = vrot.slane %v1045_v9, 4  ;;  %2913 = vmatpush.bf16.msra.mxu2 %v2865_v44  ;;  %v1095_v20 = vrot.slane %v1094_v62, 4  ;;  %v904_v60 = vld [vmem:[#allocation2 + $0x8] sm:$0xf]  ;;  %v1105_v11 = vrot.slane %v1103_v63, 4  ;;  %v2863_v23 = vld [vmem:[%s3748_s3 + $0x200] sm:$0xff] }
  0xc5   :  { %1072 = vst [vmem:[#allocation3 + $0x60] sm:$0xf] %v1046_v45  ;;  %2291 = vmatpush.bf16.msra.mxu0 %v2864_v57  ;;  %v905_v16 = vld [vmem:[#allocation2 + $0xc] sm:$0xf]  ;;  %v918_v30 = vrot.slane %v916_v10, 5  ;;  %v925_v7 = vshrl.u32 %v904_v60, 16  ;;  %v2358_v37 = vor.u32 %v2770_v15, %v2357_v1 }
  0xc6   :  { %v1049_v12 = vsel %vm3255_vm9, %v1047_v27, %v1048_v0  ;;  %v1104_v29 = vsel %vm3559_vm15, %v1095_v20, %v1103_v63  ;;  %v1114_v21 = vsel %vm3559_vm15, %v1105_v11, %v3563_v54  ;;  %v921_v28 = vrot.slane %v919_v24, 6  ;;  %v1081_v17 = vld [vmem:[#allocation2 + $0x14] sm:$0xf]  ;;  %v1082_v4 = vld [vmem:[#allocation2 + $0x18] sm:$0xf] }
  0xc7   :  { %2100 = vmatmul.bf16.gmra.mxu1 %v2410_v46  ;;  %2163 = vmatmul.bf16.gmra.mxu3 %v2454_v55  ;;  %1073 = vst [vmem:[#allocation3 + $0x84] sm:$0xf] %v1049_v12  ;;  %v928_v33 = vshll.u32 %v904_v60, 16  ;;  %v935_v14 = vshrl.u32 %v905_v16, 16  ;;  %v927_v39 = vrot.slane %v925_v7, 5  ;;  %v938_v13 = vshll.u32 %v905_v16, 16 }
  0xc8   :  { %2914 = vmatpush.bf16.msra.mxu2 %v2864_v57  ;;  %1183 = vst [vmem:[#allocation3 + $0x1c] sm:$0xf] %v1104_v29  ;;  %v922_v3 = vor.u32 %v921_v28, %v918_v30  ;;  %v1115_v8 = vrot.slane %v3563_v54, 4  ;;  %v3579_v22 = vld [vmem:[#allocation3 + $0xdc] sm:$0xf]  ;;  %v1117_v40 = vshrl.u32 %v1081_v17, 16 }
  0xc9   :  { %2187 = vmatmul.bf16.gmra.mxu0 %v2422_v49  ;;  %1184 = vst [vmem:[#allocation3 + $0x40] sm:$0xf] %v1114_v21  ;;  %v930_v56 = vrot.slane %v928_v33, 6  ;;  %v937_v5 = vrot.slane %v935_v14, 5  ;;  %v2443_v32 = vld [vmem:[#allocation3 + $0xfc] sm:$0xf0] }
  0xca   :  { %2292 = vmatpush.bf16.msra.mxu0 %v2863_v23  ;;  %v940_v18 = vrot.slane %v938_v13, 6  ;;  %v1120_v35 = vshll.u32 %v1081_v17, 16  ;;  %v1127_v42 = vshrl.u32 %v1082_v4, 16  ;;  %v923_v43 = vrot.slane %v922_v3, 4  ;;  %v1191_v44 = vld [vmem:[#allocation2 + $0x8] sm:$0xc] }
  0xcb   :  { %v931_v36 = vor.u32 %v930_v56, %v927_v39  ;;  %v1130_v31 = vshll.u32 %v1082_v4, 16  ;;  %v1192_v46 = vld [vmem:[#allocation2 + $0xc] sm:$0xf]  ;;  %v1119_v26 = vrot.slane %v1117_v40, 5  ;;  %v3585_v2 = vld [vmem:[#allocation2 + $0x10] sm:$0xf]  ;;  %v2446_v62 = vor.u32 %v3579_v22, %v2443_v32 }
  0xcc   :  { %2915 = vmatpush.bf16.msra.mxu2 %v2863_v23  ;;  %v3583_v34 = vor.u32 %v940_v18, %v937_v5  ;;  %v1122_v51 = vrot.slane %v1120_v35, 6  ;;  %v1129_v57 = vrot.slane %v1127_v42, 5  ;;  %v2457_v52 = vld [vmem:[#allocation3 + $0xe8] sm:$0xf]  ;;  %v2796_v53 = vld [vmem:[#allocation3 + $0x108] sm:$0xf0] }
  0xcd   :  { %v932_v6 = vsel %vm3559_vm15, %v923_v43, %v931_v36  ;;  %v933_v9 = vrot.slane %v931_v36, 4  ;;  %v1132_v55 = vrot.slane %v1130_v31, 6  ;;  %v2330_v41 = vrot.slane %v1191_v44, 10  ;;  %v1024_v54 = vld [vmem:[#allocation2 + $0x1c] sm:$0xf] }
  0xce   :  { %2235 = vmatmul.bf16.vlgmr.msrb.gmra.mxu2 %v2358_v37  ;;  %1011 = vst [vmem:[#allocation3 + $0x14] sm:$0xf] %v932_v6  ;;  %v1123_v38 = vor.u32 %v1122_v51, %v1119_v26  ;;  %v1214_v61 = vrot.slane %v1192_v46, 6  ;;  %v1217_v49 = vrot.slane %v3585_v2, 6  ;;  %v3602_v50 = vld [vmem:[#allocation2 + $0x20] sm:$0xf]  ;;  %v2458_v21 = vor.u32 %v2796_v53, %v2457_v52 }
  0xcf   :  { %v2766_v19 = vld [vmem:[#allocation3 + $0x1c] sm:$0xf]  ;;  %v942_v27 = vsel %vm3559_vm15, %v933_v9, %v3583_v34  ;;  %v3600_v63 = vor.u32 %v1132_v55, %v1129_v57  ;;  %v2920_v1 = vld [vmem:[%s3750_s2] ss:$0 sm:$0xff]  ;;  %v906_v12 = vld [vmem:[#allocation2 + $0x10] sm:$0xf] }
  0xd0   :  { %v2359_v45 = vld [vmem:[#allocation3 + $0x3c] sm:$0xf0]  ;;  %v3607_v20 = vadd.f32 %v2920_v1, %v479_v48  ;;  %1012 = vst [vmem:[#allocation3 + $0x38] sm:$0xf] %v942_v27  ;;  %v1124_v10 = vsel %vm3559_vm15, %v1115_v8, %v1123_v38  ;;  %v1125_v15 = vrot.slane %v1123_v38, 4  ;;  %v1215_v11 = vsel %vm3591_vm2, %v2330_v41, %v1214_v61 }
  0xd1   :  { %v2362_v60 = vor.u32 %v2766_v19, %v2359_v45  ;;  %v2393_v16 = vld [vmem:[#allocation3 + $0x60] sm:$0xf]  ;;  %v2779_v24 = vld [vmem:[#allocation3 + $0x80] sm:$0xf0]  ;;  %1185 = vst [vmem:[#allocation3 + $0x64] sm:$0xf] %v1124_v10 }
  0xd2   :  { %v1216_v29 = vrot.slane %v1214_v61, 4  ;;  %v1050_v30 = vrot.slane %v1048_v0, 4  ;;  %v1051_v7 = vrot.slane %v1024_v54, 5  ;;  %v1054_v23 = vrot.slane %v3602_v50, 5  ;;  %1245 = vst [vmem:[#allocation3 + $0x20] sm:$0xf] %v1215_v11 }
  0xd3   :  { %v1134_v28 = vsel %vm3559_vm15, %v1125_v15, %v3600_v63  ;;  %v907_v33 = vld [vmem:[#allocation2 + $0x14] sm:$0xf]  ;;  %v945_v14 = vshrl.u32 %v906_v12, 16  ;;  %v948_v0 = vshll.u32 %v906_v12, 16  ;;  %v1083_v13 = vld [vmem:[#allocation2 + $0x1c] sm:$0xf]  ;;  %v2394_v18 = vor.u32 %v2779_v24, %v2393_v16 }
  0xd4   :  { %1186 = vst [vmem:[#allocation3 + $0x88] sm:$0xf] %v1134_v28  ;;  %v1218_v37 = vsel %vm3591_vm2, %v1216_v29, %v1217_v49  ;;  %v1052_v39 = vsel %vm3255_vm9, %v1050_v30, %v1051_v7  ;;  %v1053_v58 = vrot.slane %v1051_v7, 4  ;;  %v955_v3 = vshrl.u32 %v907_v33, 16  ;;  %v1084_v42 = vld [vmem:[#allocation2 + $0x20] sm:$0xf] }
  0xd5   :  { %1246 = vst [vmem:[#allocation3 + $0x44] sm:$0xf] %v1218_v37  ;;  %v947_v17 = vrot.slane %v945_v14, 5  ;;  %v958_v56 = vshll.u32 %v907_v33, 16  ;;  %v507_v5 = vmax.f32 %v3607_v20, 0.0  ;;  %v943_v8 = vrot.slane %v3583_v34, 4 }
  0xd6   :  { %v1055_v4 = vsel %vm3255_vm9, %v1053_v58, %v1054_v23  ;;  %1074 = vst [vmem:[#allocation3 + $0xa8] sm:$0xf] %v1052_v39  ;;  %v950_v22 = vrot.slane %v948_v0, 6  ;;  %v1137_v32 = vshrl.u32 %v1083_v13, 16  ;;  %v957_v40 = vrot.slane %v955_v3, 5 }
  0xd7   :  { %2105 = vmatmul.bf16.gmra.mxu1 %v2446_v62  ;;  %2264 = vmatmul.bf16.vlgmr.msrb.gmra.mxu3 %v2362_v60  ;;  %1075 = vst [vmem:[#allocation3 + $0xcc] sm:$0xf] %v1055_v4  ;;  %v960_v35 = vrot.slane %v958_v56, 6  ;;  %v1140_v31 = vshll.u32 %v1083_v13, 16  ;;  %v1147_v44 = vshrl.u32 %v1084_v42, 16  ;;  %v1135_v48 = vrot.slane %v3600_v63, 4 }
  0xd8   :  { %v951_v43 = vor.u32 %v950_v22, %v947_v17  ;;  %v1139_v36 = vrot.slane %v1137_v32, 5  ;;  %v1150_v26 = vshll.u32 %v1084_v42, 16  ;;  %v1194_v51 = vld [vmem:[#allocation2 + $0x14] sm:$0xf]  ;;  %v1219_v57 = vrot.slane %v1217_v49, 4 }
  0xd9   :  { %2192 = vmatmul.bf16.gmra.mxu0 %v2458_v21  ;;  %v3629_v46 = vor.u32 %v960_v35, %v957_v40  ;;  %v1142_v52 = vrot.slane %v1140_v31, 6  ;;  %v1149_v53 = vrot.slane %v1147_v44, 5  ;;  %v1220_v9 = vrot.slane %v1194_v51, 6  ;;  %v2765_v55 = vld [vmem:[#allocation3 + $0x14] sm:$0xf] }
  0xda   :  { %v952_v34 = vsel %vm3559_vm15, %v943_v8, %v951_v43  ;;  %v953_v2 = vrot.slane %v951_v43, 4  ;;  %v1152_v6 = vrot.slane %v1150_v26, 6  ;;  %v2351_v41 = vld [vmem:[#allocation3 + $0x34] sm:$0xf0]  ;;  %v1195_v61 = vld [vmem:[#allocation2 + $0x18] sm:$0xf] }
  0xdb   :  { %1013 = vst [vmem:[#allocation3 + $0x5c] sm:$0xf] %v952_v34  ;;  %v1143_v38 = vor.u32 %v1142_v52, %v1139_v36  ;;  %v519_v62 = vmul.f32 0.0, %v507_v5  ;;  %v2775_v49 = vld [vmem:[#allocation3 + $0x64] sm:$0xf]  ;;  %v1221_v54 = vsel %vm3591_vm2, %v1219_v57, %v1220_v9  ;;  %v1222_v1 = vrot.slane %v1220_v9, 4 }
  0xdc   :  { %v962_v19 = vsel %vm3559_vm15, %v953_v2, %v3629_v46  ;;  %v2395_v45 = vld [vmem:[#allocation3 + $0x84] sm:$0xf0]  ;;  %v2365_v27 = vld [vmem:[#allocation3 + $0x20] sm:$0xf]  ;;  %v3637_v63 = vor.u32 %v1152_v6, %v1149_v53  ;;  %v2771_v20 = vld [vmem:[#allocation3 + $0x40] sm:$0xf0]  ;;  %v2354_v21 = vor.u32 %v2765_v55, %v2351_v41 }
  0xdd   :  { %1014 = vst [vmem:[#allocation3 + $0x80] sm:$0xf] %v962_v19  ;;  %v1144_v60 = vsel %vm3559_vm15, %v1135_v48, %v1143_v38  ;;  %v1145_v10 = vrot.slane %v1143_v38, 4  ;;  %v1223_v15 = vrot.slane %v1195_v61, 6  ;;  %v531_v11 = vpack.c.bf16 %v519_v62, %v519_v62  ;;  %v1026_v12 = vld [vmem:[#allocation2 + $0x24] sm:$0xf] }
  0xde   :  { %2240 = vmatmul.bf16.gmra.mxu2 %v2394_v18  ;;  %1247 = vst [vmem:[#allocation3 + $0x68] sm:$0xf] %v1221_v54  ;;  %v1056_v16 = vrot.slane %v1054_v23, 4  ;;  %v1057_v30 = vrot.slane %v1026_v12, 5  ;;  %v908_v7 = vld [vmem:[#allocation2 + $0x18] sm:$0xf]  ;;  %v2398_v37 = vor.u32 %v2775_v49, %v2395_v45  ;;  %v2366_v39 = vor.u32 %v2771_v20, %v2365_v27 }
  0xdf   :  { %1187 = vst [vmem:[#allocation3 + $0xac] sm:$0xf] %v1144_v60  ;;  %v1154_v24 = vsel %vm3559_vm15, %v1145_v10, %v3637_v63  ;;  %v1224_v29 = vsel %vm3591_vm2, %v1222_v1, %v1223_v15  ;;  %v909_v28 = vld [vmem:[#allocation2 + $0x1c] sm:$0xf]  ;;  %v965_v33 = vshrl.u32 %v908_v7, 16  ;;  %v968_v14 = vshll.u32 %v908_v7, 16 }
  0xe0   :  { %543 = vst [vmem:[#allocation2 + $0x28] sm:$0xf] %v531_v11  ;;  %v1058_v50 = vsel %vm3255_vm9, %v1056_v16, %v1057_v30  ;;  %v975_v23 = vshrl.u32 %v909_v28, 16  ;;  %v963_v58 = vrot.slane %v3629_v46, 4  ;;  %v978_v17 = vshll.u32 %v909_v28, 16 }
  0xe1   :  { %1188 = vst [vmem:[#allocation3 + $0xd0] sm:$0xf] %v1154_v24  ;;  %v967_v0 = vrot.slane %v965_v33, 5  ;;  %v970_v13 = vrot.slane %v968_v14, 6  ;;  %v1085_v56 = vld [vmem:[#allocation2 + $0x24] sm:$0xf] }
  0xe2   :  { %1248 = vst [vmem:[#allocation3 + $0x8c] sm:$0xf] %v1224_v29  ;;  %v977_v3 = vrot.slane %v975_v23, 5  ;;  %v1225_v5 = vrot.slane %v1223_v15, 4  ;;  %v2429_v4 = vld [vmem:[#allocation3 + $0xa8] sm:$0xf] }
  0xe3   :  { %1076 = vst [vmem:[#allocation3 + $0xf0] sm:$0xf] %v1058_v50  ;;  %v971_v8 = vor.u32 %v970_v13, %v967_v0  ;;  %v980_v22 = vrot.slane %v978_v17, 6  ;;  %v1157_v32 = vshrl.u32 %v1085_v56, 16  ;;  %v1196_v18 = vld [vmem:[#allocation2 + $0x1c] sm:$0xf] }
  0xe4   :  { %v2788_v40 = vld [vmem:[#allocation3 + $0xc8] sm:$0xf0]  ;;  %v1059_v35 = vrot.slane %v1057_v30, 4  ;;  %v1155_v42 = vrot.slane %v3637_v63, 4  ;;  %v1160_v43 = vshll.u32 %v1085_v56, 16  ;;  %v1226_v36 = vrot.slane %v1196_v18, 6 }
  0xe5   :  { %v972_v44 = vsel %vm3559_vm15, %v963_v58, %v971_v8  ;;  %v973_v46 = vrot.slane %v971_v8, 4  ;;  %v3656_v48 = vor.u32 %v980_v22, %v977_v3  ;;  %v1159_v51 = vrot.slane %v1157_v32, 5  ;;  %v1197_v2 = vld [vmem:[#allocation2 + $0x20] sm:$0xf]  ;;  %v2774_v61 = vld [vmem:[#allocation3 + $0x5c] sm:$0xf] }
  0xe6   :  { %1015 = vst [vmem:[#allocation3 + $0xa4] sm:$0xf] %v972_v44  ;;  %v1162_v34 = vrot.slane %v1160_v43, 6  ;;  %v1227_v52 = vsel %vm3591_vm2, %v1225_v5, %v1226_v36  ;;  %v2430_v53 = vor.u32 %v2788_v40, %v2429_v4  ;;  %v1228_v38 = vrot.slane %v1226_v36, 4  ;;  %v2387_v62 = vld [vmem:[#allocation3 + $0x7c] sm:$0xf0] }
  0xe7   :  { %2206 = vmatmul.bf16.vlgmr.msra.gmra.mxu1 %v2354_v21  ;;  %2269 = vmatmul.bf16.gmra.mxu3 %v2398_v37  ;;  %v1027_v31 = vld [vmem:[#allocation2 + $0x28] sm:$0x1]  ;;  %v982_v6 = vsel %vm3559_vm15, %v973_v46, %v3656_v48  ;;  %1249 = vst [vmem:[#allocation3 + $0xb0] sm:$0xf] %v1227_v52  ;;  %v1229_v27 = vrot.slane %v1197_v2, 6  ;;  %v2390_v37 = vor.u32 %v2774_v61, %v2387_v62  ;;  %v983_v0 = vrot.slane %v3656_v48, 4 }
  0xe8   :  { %v1086_v26 = vld [vmem:[#allocation2 + $0x28] sm:$0x3]  ;;  %v1060_v57 = vrot.slane %v1027_v31, 5  ;;  %1016 = vst [vmem:[#allocation3 + $0xc8] sm:$0xf] %v982_v6  ;;  %v1163_v19 = vor.u32 %v1162_v34, %v1159_v51 }
  0xe9   :  { %2293 = vmatmul.bf16.vlgmr.msra.gmra.mxu0 %v2366_v39  ;;  %v1167_v9 = vshrl.u32 %v1086_v26, 16  ;;  %v1170_v55 = vshll.u32 %v1086_v26, 16  ;;  %v1198_v1 = vld [vmem:[#allocation2 + $0x24] sm:$0xf]  ;;  %v1199_v20 = vld [vmem:[#allocation2 + $0x28] sm:$0x3]  ;;  %v1230_v25 = vsel %vm3591_vm2, %v1228_v38, %v1229_v27 }
  0xea   :  { %v1061_v41 = vsel %vm3255_vm9, %v1059_v35, %v1060_v57  ;;  %v1164_v63 = vsel %vm3559_vm15, %v1155_v42, %v1163_v19  ;;  %v1165_v54 = vrot.slane %v1163_v19, 4  ;;  %v1231_v10 = vrot.slane %v1229_v27, 4  ;;  %v910_v11 = vld [vmem:[#allocation2 + $0x20] sm:$0xf]  ;;  %v2401_v12 = vld [vmem:[#allocation3 + $0x68] sm:$0xf] }
  0xeb   :  { %1077 = vst [vmem:[#allocation3 + $0x114] sm:$0xf] %v1061_v41  ;;  %v1169_v49 = vrot.slane %v1167_v9, 5  ;;  %v1172_v45 = vrot.slane %v1170_v55, 6  ;;  %v1232_v15 = vrot.slane %v1198_v1, 6  ;;  %v1235_v16 = vrot.slane %v1199_v20, 6 }
  0xec   :  { %1189 = vst [vmem:[#allocation3 + $0xf4] sm:$0xf] %v1164_v63  ;;  %v911_v24 = vld [vmem:[#allocation2 + $0x24] sm:$0x3]  ;;  %v985_v29 = vshrl.u32 %v910_v11, 16  ;;  %v988_v14 = vshll.u32 %v910_v11, 16 }
  0xed   :  { %v1173_v60 = vor.u32 %v1172_v45, %v1169_v49  ;;  %1250 = vst [vmem:[#allocation3 + $0xd4] sm:$0xf] %v1230_v25  ;;  %v2784_v30 = vld [vmem:[#allocation3 + $0xac] sm:$0xf]  ;;  %v2431_v7 = vld [vmem:[#allocation3 + $0xcc] sm:$0xf0]  ;;  %v1233_v28 = vsel %vm3591_vm2, %v1231_v10, %v1232_v15 }
  0xee   :  { %2245 = vmatmul.bf16.gmra.mxu2 %v2430_v53  ;;  %v1234_v33 = vrot.slane %v1232_v15, 4  ;;  %v2780_v39 = vld [vmem:[#allocation3 + $0x88] sm:$0xf0]  ;;  %v987_v50 = vrot.slane %v985_v29, 5  ;;  %v995_v23 = vshrl.u32 %v911_v24, 16  ;;  %v990_v13 = vrot.slane %v988_v14, 6 }
  0xef   :  { %v1174_v21 = vsel %vm3559_vm15, %v1165_v54, %v1173_v60  ;;  %1251 = vst [vmem:[#allocation3 + $0xf8] sm:$0xf] %v1233_v28  ;;  %v998_v17 = vshll.u32 %v911_v24, 16  ;;  %v2434_v3 = vor.u32 %v2784_v30, %v2431_v7  ;;  %v2402_v5 = vor.u32 %v2780_v39, %v2401_v12  ;;  %v2465_v59 = vld [vmem:[#allocation3 + $0xf0] sm:$0xf] }
  0xf0   :  { %1190 = vst [vmem:[#allocation3 + $0x118] sm:$0xf] %v1174_v21  ;;  %v1236_v58 = vsel %vm3591_vm2, %v1234_v33, %v1235_v16  ;;  %v997_v56 = vrot.slane %v995_v23, 5  ;;  %v991_v4 = vor.u32 %v990_v13, %v987_v50  ;;  %v2783_v43 = vld [vmem:[#allocation3 + $0xa4] sm:$0xf] }
  0xf1   :  { %1252 = vst [vmem:[#allocation3 + $0x11c] sm:$0xf] %v1236_v58  ;;  %v1000_v8 = vrot.slane %v998_v17, 6  ;;  %v2423_v36 = vld [vmem:[#allocation3 + $0xc4] sm:$0xf0] }
  0xf2   :  { %v992_v22 = vsel %vm3559_vm15, %v983_v0, %v991_v4  ;;  %v993_v32 = vrot.slane %v991_v4, 4  ;;  %v2797_v40 = vld [vmem:[#allocation3 + $0x110] sm:$0xf0]  ;;  %v2437_v46 = vld [vmem:[#allocation3 + $0xb0] sm:$0xf]  ;;  %v2426_v26 = vor.u32 %v2783_v43, %v2423_v36 }
  0xf3   :  { %v1001_v18 = vor.u32 %v1000_v8, %v997_v56  ;;  %1017 = vst [vmem:[#allocation3 + $0xec] sm:$0xf] %v992_v22  ;;  %v2466_v42 = vor.u32 %v2797_v40, %v2465_v59  ;;  %v2793_v31 = vld [vmem:[#allocation3 + $0xf4] sm:$0xf] }
  0xf4   :  { %v2789_v48 = vld [vmem:[#allocation3 + $0xd0] sm:$0xf0] }
  0xf5   :  { %v1002_v35 = vsel %vm3559_vm15, %v993_v32, %v1001_v18  ;;  %v2438_v34 = vor.u32 %v2789_v48, %v2437_v46 }
  0xf6   :  { %1018 = vst [vmem:[#allocation3 + $0x110] sm:$0xf] %v1002_v35  ;;  %v2473_v52 = vld [vmem:[#allocation3 + $0xf8] sm:$0xf] }
  0xf7   :  { %2211 = vmatmul.bf16.gmra.mxu1 %v2390_v37  ;;  %2274 = vmatmul.bf16.gmra.mxu3 %v2434_v3  ;;  %v2467_v44 = vld [vmem:[#allocation3 + $0x114] sm:$0xf0] }
  0xf8   :  { %v2470_v57 = vor.u32 %v2793_v31, %v2467_v44  ;;  %v2798_v53 = vld [vmem:[#allocation3 + $0x118] sm:$0xf0] }
  0xf9   :  { %2298 = vmatmul.bf16.gmra.mxu0 %v2402_v5  ;;  %v2474_v47 = vor.u32 %v2798_v53, %v2473_v52 }
  0xfa   :  { %v2792_v55 = vld [vmem:[#allocation3 + $0xec] sm:$0xf] }
  0xfd   :  { %v2459_v41 = vld [vmem:[#allocation3 + $0x10c] sm:$0xf0] }
  0xfe   :  { %2250 = vmatmul.bf16.gmra.mxu2 %v2466_v42  ;;  %v2462_v38 = vor.u32 %v2792_v55, %v2459_v41 }
 0x104   :  { %v2072_v51 = vpop.f32.mrf.mxu1 }
 0x106   :  { %v2062_v2 = vpop.f32.mrf.mxu0 }
 0x107   :  { %2216 = vmatmul.bf16.gmra.mxu1 %v2426_v26  ;;  %2279 = vmatmul.bf16.gmra.mxu3 %v2470_v57 }
 0x109   :  { %2303 = vmatmul.bf16.gmra.mxu0 %v2438_v34 }
 0x10c   :  { %v2074_v6 = vpop.f32.mrf.mxu1 }
 0x10e   :  { %v2064_v9 = vpop.f32.mrf.mxu0  ;;  %2308 = vmatmul.bf16.vlgmr.msra.gmra.mxu2 %v2474_v47 }
 0x111   :  { %v2120_v19 = vpop.f32.mrf.mxu2 }
 0x114   :  { %v2077_v61 = vpop.f32.mrf.mxu1 }
 0x116   :  { %v2067_v62 = vpop.f32.mrf.mxu0 }
 0x117   :  { %2221 = vmatmul.bf16.gmra.mxu1 %v2462_v38 }
 0x119   :  { %v2122_v49 = vpop.f32.mrf.mxu2 }
 0x11a   :  { %v2149_v45 = vpop.f32.mrf.mxu3 }
 0x11c   :  { %v2079_v27 = vpop.f32.mrf.mxu1 }
 0x11e   :  { %v2069_v63 = vpop.f32.mrf.mxu0 }
 0x121   :  { %v2125_v54 = vpop.f32.mrf.mxu2 }
 0x122   :  { %v2151_v1 = vpop.f32.mrf.mxu3 }
 0x124   :  { %v2091_v20 = vpop.f32.mrf.mxu1 }
 0x125   :  { %v2092_v60 = vadd.f32 %v2091_v20, %v2062_v2 }
 0x126   :  { %v2178_v25 = vpop.f32.mrf.mxu0 }
 0x127   :  { %v2121_v10 = vadd.f32 %v2120_v19, %v2092_v60 }
 0x129   :  { %v2127_v15 = vpop.f32.mrf.mxu2  ;;  %v2150_v34 = vadd.f32 %v2149_v45, %v2121_v10 }
 0x12a   :  { %v2154_v11 = vpop.f32.mrf.mxu3 }
 0x12b   :  { %v2179_v53 = vadd.f32 %v2178_v25, %v2150_v34 }
 0x12c   :  { %v2093_v12 = vpop.f32.mrf.mxu1 }
 0x12d   :  { %v2094_v16 = vadd.f32 %v2093_v12, %v2064_v9 }
 0x12e   :  { %v2180_v24 = vpop.f32.mrf.mxu0 }
 0x12f   :  { %v2123_v29 = vadd.f32 %v2122_v49, %v2094_v16 }
 0x131   :  { %v2130_v30 = vpop.f32.mrf.mxu2  ;;  %v2152_v41 = vadd.f32 %v2151_v1, %v2123_v29 }
 0x132   :  { %v3680_v7 = vpop.f32.mrf.mxu3 }
 0x134   :  { %v2096_v21 = vpop.f32.mrf.mxu1 }
 0x135   :  { %v2097_v28 = vadd.f32 %v2096_v21, %v2067_v62  ;;  %v2181_v62 = vadd.f32 %v2180_v24, %v2152_v41 }
 0x136   :  { %v2183_v33 = vpop.f32.mrf.mxu0 }
 0x137   :  { %v2126_v14 = vadd.f32 %v2125_v54, %v2097_v28 }
 0x139   :  { %v2132_v37 = vpop.f32.mrf.mxu2  ;;  %v2155_v20 = vadd.f32 %v2154_v11, %v2126_v14 }
 0x13a   :  { %v3682_v39 = vpop.f32.mrf.mxu3 }
 0x13b   :  { %v2184_v1 = vadd.f32 %v2183_v33, %v2155_v20 }
 0x13c   :  { %v2098_v50 = vpop.f32.mrf.mxu1 }
 0x13d   :  { %v2099_v23 = vadd.f32 %v2098_v50, %v2069_v63 }
 0x13e   :  { %v2185_v58 = vpop.f32.mrf.mxu0 }
 0x13f   :  { %v2128_v0 = vadd.f32 %v2127_v15, %v2099_v23 }
 0x141   :  { %v2135_v13 = vpop.f32.mrf.mxu2  ;;  %v2157_v29 = vadd.f32 %v3680_v7, %v2128_v0 }
 0x142   :  { %v3684_v17 = vpop.f32.mrf.mxu3 }
 0x143   :  { %v2186_v11 = vadd.f32 %v2185_v58, %v2157_v29 }
 0x144   :  { %v2101_v3 = vpop.f32.mrf.mxu1 }
 0x145   :  { %v2102_v56 = vadd.f32 %v2101_v3, %v2072_v51 }
 0x146   :  { %v3686_v5 = vpop.f32.mrf.mxu0 }
 0x147   :  { %v2131_v4 = vadd.f32 %v2130_v30, %v2102_v56 }
 0x149   :  { %v2137_v8 = vpop.f32.mrf.mxu2 }
 0x14a   :  { %v3688_v22 = vpop.f32.mrf.mxu3 }
 0x14c   :  { %v2103_v32 = vpop.f32.mrf.mxu1 }
 0x14d   :  { %v2104_v18 = vadd.f32 %v2103_v32, %v2074_v6 }
 0x14e   :  { %v3690_v59 = vpop.f32.mrf.mxu0 }
 0x14f   :  { %v3692_v40 = vadd.f32 %v2132_v37, %v2104_v18 }
 0x151   :  { %v2236_v35 = vpop.f32.mrf.mxu2 }
 0x152   :  { %v3694_v42 = vpop.f32.mrf.mxu3 }
 0x154   :  { %v2106_v43 = vpop.f32.mrf.mxu1 }
 0x155   :  { %v2107_v36 = vadd.f32 %v2106_v43, %v2077_v61  ;;  %v2162_v43 = vadd.f32 %v3684_v17, %v3692_v40 }
 0x156   :  { %v3696_v31 = vpop.f32.mrf.mxu0 }
 0x157   :  { %v3698_v44 = vadd.f32 %v2135_v13, %v2107_v36  ;;  %v2160_v13 = vadd.f32 %v3682_v39, %v2131_v4  ;;  %v2191_v4 = vadd.f32 %v3690_v59, %v2162_v43 }
 0x159   :  { %v2238_v46 = vpop.f32.mrf.mxu2  ;;  %v2189_v7 = vadd.f32 %v3686_v5, %v2160_v13  ;;  %v2165_v34 = vadd.f32 %v3688_v22, %v3698_v44 }
 0x15a   :  { %v2265_v48 = vpop.f32.mrf.mxu3 }
 0x15b   :  { %v2194_v40 = vadd.f32 %v3696_v31, %v2165_v34 }
 0x15c   :  { %v2108_v26 = vpop.f32.mrf.mxu1 }
 0x15d   :  { %v2109_v51 = vadd.f32 %v2108_v26, %v2079_v27 }
 0x15e   :  { %v3700_v57 = vpop.f32.mrf.mxu0 }
 0x15f   :  { %v3702_v2 = vadd.f32 %v2137_v8, %v2109_v51 }
 0x161   :  { %v2241_v52 = vpop.f32.mrf.mxu2 }
 0x162   :  { %v2267_v6 = vpop.f32.mrf.mxu3 }
 0x164   :  { %v2207_v47 = vpop.f32.mrf.mxu1 }
 0x165   :  { %v2208_v9 = vadd.f32 %v2207_v47, %v2179_v53 }
 0x166   :  { %v2294_v55 = vpop.f32.mrf.mxu0 }
 0x167   :  { %v2237_v19 = vadd.f32 %v2236_v35, %v2208_v9 }
 0x169   :  { %v2266_v38 = vadd.f32 %v2265_v48, %v2237_v19  ;;  %v2243_v61 = vpop.f32.mrf.mxu2 }
 0x16a   :  { %v2270_v27 = vpop.f32.mrf.mxu3 }
 0x16b   :  { %v2295_v49 = vadd.f32 %v2294_v55, %v2266_v38  ;;  %v2167_v55 = vadd.f32 %v3694_v42, %v3702_v2 }
 0x16c   :  { %v2209_v63 = vpop.f32.mrf.mxu1 }
 0x16d   :  { %2315 = vst.msk [vmem:[%s3752_s4] sm:$0xff] %vm2314_vm0, %v2295_v49  ;;  %v2210_v45 = vadd.f32 %v2209_v63, %v2181_v62  ;;  %v2196_v44 = vadd.f32 %v3700_v57, %v2167_v55 }
 0x16e   :  { %v2296_v54 = vpop.f32.mrf.mxu0 }
 0x16f   :  { %v2239_v60 = vadd.f32 %v2238_v46, %v2210_v45 }
 0x171   :  { %v2268_v25 = vadd.f32 %v2267_v6, %v2239_v60  ;;  %v2246_v10 = vpop.f32.mrf.mxu2 }
 0x172   :  { %v2272_v21 = vpop.f32.mrf.mxu3 }
 0x173   :  { %v2297_v15 = vadd.f32 %v2296_v54, %v2268_v25 }
 0x174   :  { %v2212_v12 = vpop.f32.mrf.mxu1 }
 0x175   :  { %2316 = vst.msk [vmem:[%s3752_s4 + $0x8] sm:$0xff] %vm2314_vm0, %v2297_v15  ;;  %v2213_v16 = vadd.f32 %v2212_v12, %v2184_v1 }
 0x176   :  { %v2299_v24 = vpop.f32.mrf.mxu0 }
 0x177   :  { %v2242_v30 = vadd.f32 %v2241_v52, %v2213_v16 }
 0x179   :  { %v2271_v28 = vadd.f32 %v2270_v27, %v2242_v30  ;;  %v2248_v37 = vpop.f32.mrf.mxu2 }
 0x17a   :  { %v2275_v8 = vpop.f32.mrf.mxu3 }
 0x17b   :  { %v2300_v14 = vadd.f32 %v2299_v24, %v2271_v28 }
 0x17c   :  { %v2214_v50 = vpop.f32.mrf.mxu1 }
 0x17d   :  { %2317 = vst.msk [vmem:[%s3752_s4 + $0x10] sm:$0xff] %vm2314_vm0, %v2300_v14  ;;  %v2215_v33 = vadd.f32 %v2214_v50, %v2186_v11 }
 0x17e   :  { %v2301_v23 = vpop.f32.mrf.mxu0 }
 0x17f   :  { %v2244_v3 = vadd.f32 %v2243_v61, %v2215_v33 }
 0x181   :  { %v2273_v56 = vadd.f32 %v2272_v21, %v2244_v3  ;;  %v2251_v32 = vpop.f32.mrf.mxu2 }
 0x182   :  { %v2277_v48 = vpop.f32.mrf.mxu3 }
 0x183   :  { %v2302_v0 = vadd.f32 %v2301_v23, %v2273_v56 }
 0x184   :  { %v2217_v18 = vpop.f32.mrf.mxu1 }
 0x185   :  { %2318 = vst.msk [vmem:[%s3752_s4 + $0x18] sm:$0xff] %vm2314_vm0, %v2302_v0  ;;  %v2218_v58 = vadd.f32 %v2217_v18, %v2189_v7 }
 0x186   :  { %v2304_v35 = vpop.f32.mrf.mxu0 }
 0x187   :  { %v2247_v36 = vadd.f32 %v2246_v10, %v2218_v58 }
 0x189   :  { %v2276_v39 = vadd.f32 %v2275_v8, %v2247_v36  ;;  %v2253_v51 = vpop.f32.mrf.mxu2 }
 0x18a   :  { %v2280_v9 = vpop.f32.mrf.mxu3 }
 0x18b   :  { %v2305_v46 = vadd.f32 %v2304_v35, %v2276_v39 }
 0x18c   :  { %v2219_v5 = vpop.f32.mrf.mxu1 }
 0x18d   :  { %2319 = vst.msk [vmem:[%s3752_s4 + $0x20] sm:$0xff] %vm2314_vm0, %v2305_v46  ;;  %v2220_v26 = vadd.f32 %v2219_v5, %v2191_v4 }
 0x18e   :  { %v2306_v53 = vpop.f32.mrf.mxu0 }
 0x18f   :  { %v2249_v52 = vadd.f32 %v2248_v37, %v2220_v26 }
 0x191   :  { %v2278_v17 = vadd.f32 %v2277_v48, %v2249_v52  ;;  %v2309_v19 = vpop.f32.mrf.mxu2 }
 0x192   :  { %v2282_v49 = vpop.f32.mrf.mxu3 }
 0x193   :  { %v2307_v47 = vadd.f32 %v2306_v53, %v2278_v17 }
 0x194   :  { %v2222_v59 = vpop.f32.mrf.mxu1 }
 0x195   :  { %2320 = vst.msk [vmem:[%s3752_s4 + $0x28] sm:$0xff] %vm2314_vm0, %v2307_v47  ;;  %v2223_v6 = vadd.f32 %v2222_v59, %v2194_v40 }
 0x197   :  { %v2252_v41 = vadd.f32 %v2251_v32, %v2223_v6 }
 0x199   :  { %v2281_v22 = vadd.f32 %v2280_v9, %v2252_v41  ;;  %v2311_v45 = vpop.f32.mrf.mxu2 }
 0x19b   :  { %v2310_v38 = vadd.f32 %v2309_v19, %v2281_v22 }
 0x19c   :  { %v2224_v61 = vpop.f32.mrf.mxu1 }
 0x19d   :  { %2321 = vst.msk [vmem:[%s3752_s4 + $0x30] sm:$0xff] %vm2314_vm0, %v2310_v38  ;;  %v2225_v31 = vadd.f32 %v2224_v61, %v2196_v44 }
 0x19f   :  { %v2254_v62 = vadd.f32 %v2253_v51, %v2225_v31 }
 0x1a1   :  { %v2283_v63 = vadd.f32 %v2282_v49, %v2254_v62 }
 0x1a3   :  { %v2312_v27 = vadd.f32 %v2311_v45, %v2283_v63 }
 0x1a5   :  { %2322 = vst.msk [vmem:[%s3752_s4 + $0x38] sm:$0xff] %vm2314_vm0, %v2312_v27 }

</bundles_post_ra>
